<compile_context>
chip_gen: v7x
topology: tpu7x:2x2x1
jax: 0.10.0
libtpu: 0.0.40
codegen_flags: <defaults>
</compile_context>

<pallas_src>
import jax
import jax.numpy as jnp
from jax import lax
from jax.experimental import pallas as pl
from jax.experimental.pallas import tpu as pltpu


def _pick_batch_block(n):
    """Images per grid step: largest of {4,2,1} dividing N that keeps >= 2
    grid steps (so both v7x TensorCores get work)."""
    for b in (4, 2, 1):
        if n % b == 0 and n // b >= 2:
            return b
    return n if n > 0 else 1


def _make_spatial_gate_kernel(B, C, H, W, HWp, KH, KW, pad):
    HW = H * W
    KK = KH * KW

    def kernel(x_ref, wm_ref, o_ref):
        # x_ref : (B, C, HWp)     VMEM input block (lane-dense)
        # wm_ref: (KK, 2B, HWp)   VMEM, tap weight * boundary mask; rows [0,B)
        #                         carry the max-map weight, rows [B,2B) the
        #                         mean-map weight.
        # o_ref : (B, C, HWp)     VMEM output block

        # ChannelPool for all B images, stacked along sublanes -> (2B, HWp) f32.
        maxs, means = [], []
        for b in range(B):
            xb = x_ref[b]                                        # (C, HWp)
            maxs.append(jnp.max(xb, axis=0, keepdims=True).astype(jnp.float32))
            means.append(jnp.mean(xb.astype(jnp.float32), axis=0, keepdims=True))
        pooled = jnp.concatenate(maxs + means, axis=0)           # (2B, HWp)

        # 7x7 conv (padding=pad, bias=False) as implicit im2col in registers:
        # ONE lane roll per tap on the whole pooled stack, one FMA against the
        # pre-folded weight*mask tile.  49 rolls total.
        acc = jnp.zeros((2 * B, HWp), jnp.float32)
        for dh in range(KH):
            for dw in range(KW):
                k = dh * KW + dw
                s = (dh - pad) * W + (dw - pad)                  # flat source offset
                shift = (-s) % HWp                               # roll convention
                rolled = pooled if shift == 0 else pltpu.roll(pooled, shift=shift, axis=1)
                acc = acc + wm_ref[k] * rolled

        # Combine max-/mean-channel partials (one sublane add), then sigmoid
        # kept entirely on the EUP (exp + approx reciprocal).
        att = acc[0:B] + acc[B:2 * B]                            # (B, HWp)
        scale = pl.reciprocal(1.0 + jnp.exp(-att), approx=True)  # (B, HWp)

        # Gate: re-read x from VMEM (x not held live across the tap loop) and
        # do a lane-dense store in the input dtype.
        for b in range(B):
            xb = x_ref[b].astype(jnp.float32)                    # (C, HWp)
            o_ref[b] = (xb * scale[b:b + 1, :]).astype(o_ref.dtype)

    return kernel


@jax.jit
def cbam_forward(x_nchw, spatial_weight_oihw):
    """CBAM forward with defaults (no_channel=True) == SpatialGate.

    x_nchw:              (N, C, H, W)
    spatial_weight_oihw: (1, 2, 7, 7) Conv2d weight (bias=False, bn=False, relu=False)
    returns:             (N, C, H, W), same dtype as x
    """
    N, C, H, W = x_nchw.shape
    O, I, KH, KW = spatial_weight_oihw.shape
    assert O == 1 and I == 2 and KH == KW and KH % 2 == 1
    pad = (KH - 1) // 2
    HW = H * W
    KK = KH * KW
    HWp = ((HW + 127) // 128) * 128          # lane-dense stores
    B = _pick_batch_block(N)
    out_dtype = x_nchw.dtype

    # ---- layout glue: free reshape + zero-pad of the flat spatial axis ----
    x_flat = x_nchw.reshape(N, C, HW)
    if HWp != HW:
        x_flat = jnp.pad(x_flat, ((0, 0), (0, 0), (0, HWp - HW)))

    # Fold conv tap weights into the zero-padding boundary masks:
    #   wm[k, 0:B , :] = w_max[k]  * mask_k   (applied to the max maps)
    #   wm[k, B:2B, :] = w_mean[k] * mask_k   (applied to the mean maps)
    w = spatial_weight_oihw.astype(jnp.float32).reshape(2, KK)   # [w_max; w_mean]
    idx = jnp.arange(HWp, dtype=jnp.int32)
    hh, ww = idx // W, idx % W
    in_img = idx < HW
    wm_rows = []
    for dh in range(KH):
        for dw in range(KW):
            k = dh * KW + dw
            sh, sw = dh - pad, dw - pad
            valid = (in_img & (hh + sh >= 0) & (hh + sh < H) &
                     (ww + sw >= 0) & (ww + sw < W))
            mask_k = valid.astype(jnp.float32)                   # (HWp,)
            wm_rows.append(jnp.concatenate(
                [jnp.broadcast_to(w[0, k] * mask_k, (B, HWp)),
                 jnp.broadcast_to(w[1, k] * mask_k, (B, HWp))], axis=0))
    wmask = jnp.stack(wm_rows, axis=0)                           # (KK, 2B, HWp)

    kernel = _make_spatial_gate_kernel(B, C, H, W, HWp, KH, KW, pad)

    # Explicit VMEM budget: double-buffered in/out blocks + folded weight tile.
    in_bytes = B * C * HWp * jnp.dtype(x_nchw.dtype).itemsize
    out_bytes = B * C * HWp * jnp.dtype(out_dtype).itemsize
    wm_bytes = KK * 2 * B * HWp * 4
    vmem_limit = int(min(max(2 * (2 * in_bytes + 2 * out_bytes + wm_bytes) + (4 << 20),
                             32 << 20), 64 << 20))

    out_flat = pl.pallas_call(
        kernel,
        out_shape=jax.ShapeDtypeStruct((N, C, HWp), out_dtype),
        grid_spec=pltpu.PrefetchScalarGridSpec(
            num_scalar_prefetch=0,
            grid=(N // B,),
            in_specs=[
                pl.BlockSpec((B, C, HWp), lambda n: (n, 0, 0)),        # x (DMA'd once)
                pl.BlockSpec((KK, 2 * B, HWp), lambda n: (0, 0, 0)),   # weight*mask
            ],
            out_specs=pl.BlockSpec((B, C, HWp), lambda n: (n, 0, 0)),
        ),
        compiler_params=pltpu.CompilerParams(
            dimension_semantics=("parallel",),
            vmem_limit_bytes=vmem_limit,
        ),
    )(x_flat, wmask)

    return out_flat[..., :HW].reshape(N, C, H, W)


if __name__ == "__main__":
    # CBAM(gate_channels=4) -> no_channel=True, no_spatial=False:
    # forward(x) = SpatialGate(x) with a 7x7, 2->1, bias-free conv.
    N, C, H, W = 2, 4, 16, 16
    KH = KW = 7
    pad = (KH - 1) // 2

    key = jax.random.PRNGKey(0)
    kx, kw = jax.random.split(key)
    x = jax.random.normal(kx, (N, C, H, W), dtype=jnp.float32)

    # deterministic Kaiming-uniform-like init for the SpatialGate conv weight
    fan_in = 2 * KH * KW
    bound = 1.0 / (fan_in ** 0.5)
    weight = jax.random.uniform(
        kw, (1, 2, KH, KW), minval=-bound, maxval=bound, dtype=jnp.float32
    )

    out = cbam_forward(x, weight)
    out = jax.block_until_ready(out)

    # ---- plain-JAX reference mirroring the PyTorch module ------------------
    pooled = jnp.concatenate(
        [jnp.max(x, axis=1, keepdims=True), jnp.mean(x, axis=1, keepdims=True)],
        axis=1)                                                    # ChannelPool
    att = lax.conv_general_dilated(
        pooled, weight, window_strides=(1, 1),
        padding=[(pad, pad), (pad, pad)],
        dimension_numbers=("NCHW", "OIHW", "NCHW"),
        precision=lax.Precision.HIGHEST)                           # BasicConv
    ref = x * jax.nn.sigmoid(att)                                  # gating

    assert out.shape == (N, C, H, W)
    assert out.dtype == x.dtype
    err = float(jnp.max(jnp.abs(out - ref)))
    # tolerance covers the approx (EUP) reciprocal in the sigmoid
    assert jnp.allclose(out, ref, atol=2e-3, rtol=2e-3), err

    print("KERNEL_OK")
</pallas_src>

<mosaic_0001>
module attributes {stable_mosaic.version = 11 : i64} {
  func.func @kernel(%arg0: i32, %arg1: memref<1x4x256xf32, #tpu.memory_space<vmem>>, %arg2: memref<49x2x256xf32, #tpu.memory_space<vmem>>, %arg3: memref<1x4x256xf32, #tpu.memory_space<vmem>>) attributes {dimension_semantics = [#tpu.dimension_semantics<parallel>], iteration_bounds = array<i64: 2>, scalar_prefetch = 0 : i64, scratch_operands = 0 : i64, tpu.core_type = #tpu.core_type<tc>, window_params = [{transform_indices = @transform_0, window_bounds = array<i64: 1, 4, 256>}, {pipeline_mode = #tpu.pipeline_mode<synchronous>, transform_indices = @transform_1, window_bounds = array<i64: 49, 2, 256>}, {transform_indices = @transform_2, window_bounds = array<i64: 1, 4, 256>}]} {
    %c0 = arith.constant 0 : index
    %c0_0 = arith.constant 0 : index
    %c0_1 = arith.constant 0 : index
    %0 = vector.load %arg1[%c0, %c0_0, %c0_1] : memref<1x4x256xf32, #tpu.memory_space<vmem>>, vector<1x4x256xf32>
    %1 = vector.shape_cast %0 : vector<1x4x256xf32> to vector<4x256xf32>
    %cst = arith.constant dense<0xFF800000> : vector<256xf32>
    %2 = vector.multi_reduction <maximumf>, %1, %cst [0] : vector<4x256xf32> to vector<256xf32>
    %3 = vector.shape_cast %2 : vector<256xf32> to vector<1x256xf32>
    %cst_2 = arith.constant dense<0.000000e+00> : vector<256xf32>
    %4 = vector.multi_reduction <add>, %1, %cst_2 [0] : vector<4x256xf32> to vector<256xf32>
    %5 = vector.shape_cast %4 : vector<256xf32> to vector<1x256xf32>
    %cst_3 = arith.constant 4.000000e+00 : f32
    %6 = vector.broadcast %cst_3 : f32 to vector<1x256xf32>
    %7 = arith.divf %5, %6 : vector<1x256xf32>
    %8 = tpu.concatenate %3, %7 in 0 : vector<1x256xf32>, vector<1x256xf32> -> vector<2x256xf32>
    %cst_4 = arith.constant 0.000000e+00 : f32
    %9 = vector.broadcast %cst_4 : f32 to vector<2x256xf32>
    %c51_i32 = arith.constant 51 : i32
    %10 = tpu.dynamic_rotate %8 by %c51_i32 dim 1 : vector<2x256xf32>, i32 -> vector<2x256xf32>
    %c0_5 = arith.constant 0 : index
    %c0_6 = arith.constant 0 : index
    %c0_7 = arith.constant 0 : index
    %11 = vector.load %arg2[%c0_5, %c0_6, %c0_7] : memref<49x2x256xf32, #tpu.memory_space<vmem>>, vector<1x2x256xf32>
    %12 = vector.shape_cast %11 : vector<1x2x256xf32> to vector<2x256xf32>
    %13 = arith.mulf %12, %10 : vector<2x256xf32>
    %14 = arith.addf %9, %13 : vector<2x256xf32>
    %c50_i32 = arith.constant 50 : i32
    %15 = tpu.dynamic_rotate %8 by %c50_i32 dim 1 : vector<2x256xf32>, i32 -> vector<2x256xf32>
    %c1 = arith.constant 1 : index
    %c0_8 = arith.constant 0 : index
    %c0_9 = arith.constant 0 : index
    %16 = vector.load %arg2[%c1, %c0_8, %c0_9] : memref<49x2x256xf32, #tpu.memory_space<vmem>>, vector<1x2x256xf32>
    %17 = vector.shape_cast %16 : vector<1x2x256xf32> to vector<2x256xf32>
    %18 = arith.mulf %17, %15 : vector<2x256xf32>
    %19 = arith.addf %14, %18 : vector<2x256xf32>
    %c49_i32 = arith.constant 49 : i32
    %20 = tpu.dynamic_rotate %8 by %c49_i32 dim 1 : vector<2x256xf32>, i32 -> vector<2x256xf32>
    %c2 = arith.constant 2 : index
    %c0_10 = arith.constant 0 : index
    %c0_11 = arith.constant 0 : index
    %21 = vector.load %arg2[%c2, %c0_10, %c0_11] : memref<49x2x256xf32, #tpu.memory_space<vmem>>, vector<1x2x256xf32>
    %22 = vector.shape_cast %21 : vector<1x2x256xf32> to vector<2x256xf32>
    %23 = arith.mulf %22, %20 : vector<2x256xf32>
    %24 = arith.addf %19, %23 : vector<2x256xf32>
    %c48_i32 = arith.constant 48 : i32
    %25 = tpu.dynamic_rotate %8 by %c48_i32 dim 1 : vector<2x256xf32>, i32 -> vector<2x256xf32>
    %c3 = arith.constant 3 : index
    %c0_12 = arith.constant 0 : index
    %c0_13 = arith.constant 0 : index
    %26 = vector.load %arg2[%c3, %c0_12, %c0_13] : memref<49x2x256xf32, #tpu.memory_space<vmem>>, vector<1x2x256xf32>
    %27 = vector.shape_cast %26 : vector<1x2x256xf32> to vector<2x256xf32>
    %28 = arith.mulf %27, %25 : vector<2x256xf32>
    %29 = arith.addf %24, %28 : vector<2x256xf32>
    %c47_i32 = arith.constant 47 : i32
    %30 = tpu.dynamic_rotate %8 by %c47_i32 dim 1 : vector<2x256xf32>, i32 -> vector<2x256xf32>
    %c4 = arith.constant 4 : index
    %c0_14 = arith.constant 0 : index
    %c0_15 = arith.constant 0 : index
    %31 = vector.load %arg2[%c4, %c0_14, %c0_15] : memref<49x2x256xf32, #tpu.memory_space<vmem>>, vector<1x2x256xf32>
    %32 = vector.shape_cast %31 : vector<1x2x256xf32> to vector<2x256xf32>
    %33 = arith.mulf %32, %30 : vector<2x256xf32>
    %34 = arith.addf %29, %33 : vector<2x256xf32>
    %c46_i32 = arith.constant 46 : i32
    %35 = tpu.dynamic_rotate %8 by %c46_i32 dim 1 : vector<2x256xf32>, i32 -> vector<2x256xf32>
    %c5 = arith.constant 5 : index
    %c0_16 = arith.constant 0 : index
    %c0_17 = arith.constant 0 : index
    %36 = vector.load %arg2[%c5, %c0_16, %c0_17] : memref<49x2x256xf32, #tpu.memory_space<vmem>>, vector<1x2x256xf32>
    %37 = vector.shape_cast %36 : vector<1x2x256xf32> to vector<2x256xf32>
    %38 = arith.mulf %37, %35 : vector<2x256xf32>
    %39 = arith.addf %34, %38 : vector<2x256xf32>
    %c45_i32 = arith.constant 45 : i32
    %40 = tpu.dynamic_rotate %8 by %c45_i32 dim 1 : vector<2x256xf32>, i32 -> vector<2x256xf32>
    %c6 = arith.constant 6 : index
    %c0_18 = arith.constant 0 : index
    %c0_19 = arith.constant 0 : index
    %41 = vector.load %arg2[%c6, %c0_18, %c0_19] : memref<49x2x256xf32, #tpu.memory_space<vmem>>, vector<1x2x256xf32>
    %42 = vector.shape_cast %41 : vector<1x2x256xf32> to vector<2x256xf32>
    %43 = arith.mulf %42, %40 : vector<2x256xf32>
    %44 = arith.addf %39, %43 : vector<2x256xf32>
    %c35_i32 = arith.constant 35 : i32
    %45 = tpu.dynamic_rotate %8 by %c35_i32 dim 1 : vector<2x256xf32>, i32 -> vector<2x256xf32>
    %c7 = arith.constant 7 : index
    %c0_20 = arith.constant 0 : index
    %c0_21 = arith.constant 0 : index
    %46 = vector.load %arg2[%c7, %c0_20, %c0_21] : memref<49x2x256xf32, #tpu.memory_space<vmem>>, vector<1x2x256xf32>
    %47 = vector.shape_cast %46 : vector<1x2x256xf32> to vector<2x256xf32>
    %48 = arith.mulf %47, %45 : vector<2x256xf32>
    %49 = arith.addf %44, %48 : vector<2x256xf32>
    %c34_i32 = arith.constant 34 : i32
    %50 = tpu.dynamic_rotate %8 by %c34_i32 dim 1 : vector<2x256xf32>, i32 -> vector<2x256xf32>
    %c8 = arith.constant 8 : index
    %c0_22 = arith.constant 0 : index
    %c0_23 = arith.constant 0 : index
    %51 = vector.load %arg2[%c8, %c0_22, %c0_23] : memref<49x2x256xf32, #tpu.memory_space<vmem>>, vector<1x2x256xf32>
    %52 = vector.shape_cast %51 : vector<1x2x256xf32> to vector<2x256xf32>
    %53 = arith.mulf %52, %50 : vector<2x256xf32>
    %54 = arith.addf %49, %53 : vector<2x256xf32>
    %c33_i32 = arith.constant 33 : i32
    %55 = tpu.dynamic_rotate %8 by %c33_i32 dim 1 : vector<2x256xf32>, i32 -> vector<2x256xf32>
    %c9 = arith.constant 9 : index
    %c0_24 = arith.constant 0 : index
    %c0_25 = arith.constant 0 : index
    %56 = vector.load %arg2[%c9, %c0_24, %c0_25] : memref<49x2x256xf32, #tpu.memory_space<vmem>>, vector<1x2x256xf32>
    %57 = vector.shape_cast %56 : vector<1x2x256xf32> to vector<2x256xf32>
    %58 = arith.mulf %57, %55 : vector<2x256xf32>
    %59 = arith.addf %54, %58 : vector<2x256xf32>
    %c32_i32 = arith.constant 32 : i32
    %60 = tpu.dynamic_rotate %8 by %c32_i32 dim 1 : vector<2x256xf32>, i32 -> vector<2x256xf32>
    %c10 = arith.constant 10 : index
    %c0_26 = arith.constant 0 : index
    %c0_27 = arith.constant 0 : index
    %61 = vector.load %arg2[%c10, %c0_26, %c0_27] : memref<49x2x256xf32, #tpu.memory_space<vmem>>, vector<1x2x256xf32>
    %62 = vector.shape_cast %61 : vector<1x2x256xf32> to vector<2x256xf32>
    %63 = arith.mulf %62, %60 : vector<2x256xf32>
    %64 = arith.addf %59, %63 : vector<2x256xf32>
    %c31_i32 = arith.constant 31 : i32
    %65 = tpu.dynamic_rotate %8 by %c31_i32 dim 1 : vector<2x256xf32>, i32 -> vector<2x256xf32>
    %c11 = arith.constant 11 : index
    %c0_28 = arith.constant 0 : index
    %c0_29 = arith.constant 0 : index
    %66 = vector.load %arg2[%c11, %c0_28, %c0_29] : memref<49x2x256xf32, #tpu.memory_space<vmem>>, vector<1x2x256xf32>
    %67 = vector.shape_cast %66 : vector<1x2x256xf32> to vector<2x256xf32>
    %68 = arith.mulf %67, %65 : vector<2x256xf32>
    %69 = arith.addf %64, %68 : vector<2x256xf32>
    %c30_i32 = arith.constant 30 : i32
    %70 = tpu.dynamic_rotate %8 by %c30_i32 dim 1 : vector<2x256xf32>, i32 -> vector<2x256xf32>
    %c12 = arith.constant 12 : index
    %c0_30 = arith.constant 0 : index
    %c0_31 = arith.constant 0 : index
    %71 = vector.load %arg2[%c12, %c0_30, %c0_31] : memref<49x2x256xf32, #tpu.memory_space<vmem>>, vector<1x2x256xf32>
    %72 = vector.shape_cast %71 : vector<1x2x256xf32> to vector<2x256xf32>
    %73 = arith.mulf %72, %70 : vector<2x256xf32>
    %74 = arith.addf %69, %73 : vector<2x256xf32>
    %c29_i32 = arith.constant 29 : i32
    %75 = tpu.dynamic_rotate %8 by %c29_i32 dim 1 : vector<2x256xf32>, i32 -> vector<2x256xf32>
    %c13 = arith.constant 13 : index
    %c0_32 = arith.constant 0 : index
    %c0_33 = arith.constant 0 : index
    %76 = vector.load %arg2[%c13, %c0_32, %c0_33] : memref<49x2x256xf32, #tpu.memory_space<vmem>>, vector<1x2x256xf32>
    %77 = vector.shape_cast %76 : vector<1x2x256xf32> to vector<2x256xf32>
    %78 = arith.mulf %77, %75 : vector<2x256xf32>
    %79 = arith.addf %74, %78 : vector<2x256xf32>
    %c19_i32 = arith.constant 19 : i32
    %80 = tpu.dynamic_rotate %8 by %c19_i32 dim 1 : vector<2x256xf32>, i32 -> vector<2x256xf32>
    %c14 = arith.constant 14 : index
    %c0_34 = arith.constant 0 : index
    %c0_35 = arith.constant 0 : index
    %81 = vector.load %arg2[%c14, %c0_34, %c0_35] : memref<49x2x256xf32, #tpu.memory_space<vmem>>, vector<1x2x256xf32>
    %82 = vector.shape_cast %81 : vector<1x2x256xf32> to vector<2x256xf32>
    %83 = arith.mulf %82, %80 : vector<2x256xf32>
    %84 = arith.addf %79, %83 : vector<2x256xf32>
    %c18_i32 = arith.constant 18 : i32
    %85 = tpu.dynamic_rotate %8 by %c18_i32 dim 1 : vector<2x256xf32>, i32 -> vector<2x256xf32>
    %c15 = arith.constant 15 : index
    %c0_36 = arith.constant 0 : index
    %c0_37 = arith.constant 0 : index
    %86 = vector.load %arg2[%c15, %c0_36, %c0_37] : memref<49x2x256xf32, #tpu.memory_space<vmem>>, vector<1x2x256xf32>
    %87 = vector.shape_cast %86 : vector<1x2x256xf32> to vector<2x256xf32>
    %88 = arith.mulf %87, %85 : vector<2x256xf32>
    %89 = arith.addf %84, %88 : vector<2x256xf32>
    %c17_i32 = arith.constant 17 : i32
    %90 = tpu.dynamic_rotate %8 by %c17_i32 dim 1 : vector<2x256xf32>, i32 -> vector<2x256xf32>
    %c16 = arith.constant 16 : index
    %c0_38 = arith.constant 0 : index
    %c0_39 = arith.constant 0 : index
    %91 = vector.load %arg2[%c16, %c0_38, %c0_39] : memref<49x2x256xf32, #tpu.memory_space<vmem>>, vector<1x2x256xf32>
    %92 = vector.shape_cast %91 : vector<1x2x256xf32> to vector<2x256xf32>
    %93 = arith.mulf %92, %90 : vector<2x256xf32>
    %94 = arith.addf %89, %93 : vector<2x256xf32>
    %c16_i32 = arith.constant 16 : i32
    %95 = tpu.dynamic_rotate %8 by %c16_i32 dim 1 : vector<2x256xf32>, i32 -> vector<2x256xf32>
    %c17 = arith.constant 17 : index
    %c0_40 = arith.constant 0 : index
    %c0_41 = arith.constant 0 : index
    %96 = vector.load %arg2[%c17, %c0_40, %c0_41] : memref<49x2x256xf32, #tpu.memory_space<vmem>>, vector<1x2x256xf32>
    %97 = vector.shape_cast %96 : vector<1x2x256xf32> to vector<2x256xf32>
    %98 = arith.mulf %97, %95 : vector<2x256xf32>
    %99 = arith.addf %94, %98 : vector<2x256xf32>
    %c15_i32 = arith.constant 15 : i32
    %100 = tpu.dynamic_rotate %8 by %c15_i32 dim 1 : vector<2x256xf32>, i32 -> vector<2x256xf32>
    %c18 = arith.constant 18 : index
    %c0_42 = arith.constant 0 : index
    %c0_43 = arith.constant 0 : index
    %101 = vector.load %arg2[%c18, %c0_42, %c0_43] : memref<49x2x256xf32, #tpu.memory_space<vmem>>, vector<1x2x256xf32>
    %102 = vector.shape_cast %101 : vector<1x2x256xf32> to vector<2x256xf32>
    %103 = arith.mulf %102, %100 : vector<2x256xf32>
    %104 = arith.addf %99, %103 : vector<2x256xf32>
    %c14_i32 = arith.constant 14 : i32
    %105 = tpu.dynamic_rotate %8 by %c14_i32 dim 1 : vector<2x256xf32>, i32 -> vector<2x256xf32>
    %c19 = arith.constant 19 : index
    %c0_44 = arith.constant 0 : index
    %c0_45 = arith.constant 0 : index
    %106 = vector.load %arg2[%c19, %c0_44, %c0_45] : memref<49x2x256xf32, #tpu.memory_space<vmem>>, vector<1x2x256xf32>
    %107 = vector.shape_cast %106 : vector<1x2x256xf32> to vector<2x256xf32>
    %108 = arith.mulf %107, %105 : vector<2x256xf32>
    %109 = arith.addf %104, %108 : vector<2x256xf32>
    %c13_i32 = arith.constant 13 : i32
    %110 = tpu.dynamic_rotate %8 by %c13_i32 dim 1 : vector<2x256xf32>, i32 -> vector<2x256xf32>
    %c20 = arith.constant 20 : index
    %c0_46 = arith.constant 0 : index
    %c0_47 = arith.constant 0 : index
    %111 = vector.load %arg2[%c20, %c0_46, %c0_47] : memref<49x2x256xf32, #tpu.memory_space<vmem>>, vector<1x2x256xf32>
    %112 = vector.shape_cast %111 : vector<1x2x256xf32> to vector<2x256xf32>
    %113 = arith.mulf %112, %110 : vector<2x256xf32>
    %114 = arith.addf %109, %113 : vector<2x256xf32>
    %c3_i32 = arith.constant 3 : i32
    %115 = tpu.dynamic_rotate %8 by %c3_i32 dim 1 : vector<2x256xf32>, i32 -> vector<2x256xf32>
    %c21 = arith.constant 21 : index
    %c0_48 = arith.constant 0 : index
    %c0_49 = arith.constant 0 : index
    %116 = vector.load %arg2[%c21, %c0_48, %c0_49] : memref<49x2x256xf32, #tpu.memory_space<vmem>>, vector<1x2x256xf32>
    %117 = vector.shape_cast %116 : vector<1x2x256xf32> to vector<2x256xf32>
    %118 = arith.mulf %117, %115 : vector<2x256xf32>
    %119 = arith.addf %114, %118 : vector<2x256xf32>
    %c2_i32 = arith.constant 2 : i32
    %120 = tpu.dynamic_rotate %8 by %c2_i32 dim 1 : vector<2x256xf32>, i32 -> vector<2x256xf32>
    %c22 = arith.constant 22 : index
    %c0_50 = arith.constant 0 : index
    %c0_51 = arith.constant 0 : index
    %121 = vector.load %arg2[%c22, %c0_50, %c0_51] : memref<49x2x256xf32, #tpu.memory_space<vmem>>, vector<1x2x256xf32>
    %122 = vector.shape_cast %121 : vector<1x2x256xf32> to vector<2x256xf32>
    %123 = arith.mulf %122, %120 : vector<2x256xf32>
    %124 = arith.addf %119, %123 : vector<2x256xf32>
    %c1_i32 = arith.constant 1 : i32
    %125 = tpu.dynamic_rotate %8 by %c1_i32 dim 1 : vector<2x256xf32>, i32 -> vector<2x256xf32>
    %c23 = arith.constant 23 : index
    %c0_52 = arith.constant 0 : index
    %c0_53 = arith.constant 0 : index
    %126 = vector.load %arg2[%c23, %c0_52, %c0_53] : memref<49x2x256xf32, #tpu.memory_space<vmem>>, vector<1x2x256xf32>
    %127 = vector.shape_cast %126 : vector<1x2x256xf32> to vector<2x256xf32>
    %128 = arith.mulf %127, %125 : vector<2x256xf32>
    %129 = arith.addf %124, %128 : vector<2x256xf32>
    %c24 = arith.constant 24 : index
    %c0_54 = arith.constant 0 : index
    %c0_55 = arith.constant 0 : index
    %130 = vector.load %arg2[%c24, %c0_54, %c0_55] : memref<49x2x256xf32, #tpu.memory_space<vmem>>, vector<1x2x256xf32>
    %131 = vector.shape_cast %130 : vector<1x2x256xf32> to vector<2x256xf32>
    %132 = arith.mulf %131, %8 : vector<2x256xf32>
    %133 = arith.addf %129, %132 : vector<2x256xf32>
    %c255_i32 = arith.constant 255 : i32
    %134 = tpu.dynamic_rotate %8 by %c255_i32 dim 1 : vector<2x256xf32>, i32 -> vector<2x256xf32>
    %c25 = arith.constant 25 : index
    %c0_56 = arith.constant 0 : index
    %c0_57 = arith.constant 0 : index
    %135 = vector.load %arg2[%c25, %c0_56, %c0_57] : memref<49x2x256xf32, #tpu.memory_space<vmem>>, vector<1x2x256xf32>
    %136 = vector.shape_cast %135 : vector<1x2x256xf32> to vector<2x256xf32>
    %137 = arith.mulf %136, %134 : vector<2x256xf32>
    %138 = arith.addf %133, %137 : vector<2x256xf32>
    %c254_i32 = arith.constant 254 : i32
    %139 = tpu.dynamic_rotate %8 by %c254_i32 dim 1 : vector<2x256xf32>, i32 -> vector<2x256xf32>
    %c26 = arith.constant 26 : index
    %c0_58 = arith.constant 0 : index
    %c0_59 = arith.constant 0 : index
    %140 = vector.load %arg2[%c26, %c0_58, %c0_59] : memref<49x2x256xf32, #tpu.memory_space<vmem>>, vector<1x2x256xf32>
    %141 = vector.shape_cast %140 : vector<1x2x256xf32> to vector<2x256xf32>
    %142 = arith.mulf %141, %139 : vector<2x256xf32>
    %143 = arith.addf %138, %142 : vector<2x256xf32>
    %c253_i32 = arith.constant 253 : i32
    %144 = tpu.dynamic_rotate %8 by %c253_i32 dim 1 : vector<2x256xf32>, i32 -> vector<2x256xf32>
    %c27 = arith.constant 27 : index
    %c0_60 = arith.constant 0 : index
    %c0_61 = arith.constant 0 : index
    %145 = vector.load %arg2[%c27, %c0_60, %c0_61] : memref<49x2x256xf32, #tpu.memory_space<vmem>>, vector<1x2x256xf32>
    %146 = vector.shape_cast %145 : vector<1x2x256xf32> to vector<2x256xf32>
    %147 = arith.mulf %146, %144 : vector<2x256xf32>
    %148 = arith.addf %143, %147 : vector<2x256xf32>
    %c243_i32 = arith.constant 243 : i32
    %149 = tpu.dynamic_rotate %8 by %c243_i32 dim 1 : vector<2x256xf32>, i32 -> vector<2x256xf32>
    %c28 = arith.constant 28 : index
    %c0_62 = arith.constant 0 : index
    %c0_63 = arith.constant 0 : index
    %150 = vector.load %arg2[%c28, %c0_62, %c0_63] : memref<49x2x256xf32, #tpu.memory_space<vmem>>, vector<1x2x256xf32>
    %151 = vector.shape_cast %150 : vector<1x2x256xf32> to vector<2x256xf32>
    %152 = arith.mulf %151, %149 : vector<2x256xf32>
    %153 = arith.addf %148, %152 : vector<2x256xf32>
    %c242_i32 = arith.constant 242 : i32
    %154 = tpu.dynamic_rotate %8 by %c242_i32 dim 1 : vector<2x256xf32>, i32 -> vector<2x256xf32>
    %c29 = arith.constant 29 : index
    %c0_64 = arith.constant 0 : index
    %c0_65 = arith.constant 0 : index
    %155 = vector.load %arg2[%c29, %c0_64, %c0_65] : memref<49x2x256xf32, #tpu.memory_space<vmem>>, vector<1x2x256xf32>
    %156 = vector.shape_cast %155 : vector<1x2x256xf32> to vector<2x256xf32>
    %157 = arith.mulf %156, %154 : vector<2x256xf32>
    %158 = arith.addf %153, %157 : vector<2x256xf32>
    %c241_i32 = arith.constant 241 : i32
    %159 = tpu.dynamic_rotate %8 by %c241_i32 dim 1 : vector<2x256xf32>, i32 -> vector<2x256xf32>
    %c30 = arith.constant 30 : index
    %c0_66 = arith.constant 0 : index
    %c0_67 = arith.constant 0 : index
    %160 = vector.load %arg2[%c30, %c0_66, %c0_67] : memref<49x2x256xf32, #tpu.memory_space<vmem>>, vector<1x2x256xf32>
    %161 = vector.shape_cast %160 : vector<1x2x256xf32> to vector<2x256xf32>
    %162 = arith.mulf %161, %159 : vector<2x256xf32>
    %163 = arith.addf %158, %162 : vector<2x256xf32>
    %c240_i32 = arith.constant 240 : i32
    %164 = tpu.dynamic_rotate %8 by %c240_i32 dim 1 : vector<2x256xf32>, i32 -> vector<2x256xf32>
    %c31 = arith.constant 31 : index
    %c0_68 = arith.constant 0 : index
    %c0_69 = arith.constant 0 : index
    %165 = vector.load %arg2[%c31, %c0_68, %c0_69] : memref<49x2x256xf32, #tpu.memory_space<vmem>>, vector<1x2x256xf32>
    %166 = vector.shape_cast %165 : vector<1x2x256xf32> to vector<2x256xf32>
    %167 = arith.mulf %166, %164 : vector<2x256xf32>
    %168 = arith.addf %163, %167 : vector<2x256xf32>
    %c239_i32 = arith.constant 239 : i32
    %169 = tpu.dynamic_rotate %8 by %c239_i32 dim 1 : vector<2x256xf32>, i32 -> vector<2x256xf32>
    %c32 = arith.constant 32 : index
    %c0_70 = arith.constant 0 : index
    %c0_71 = arith.constant 0 : index
    %170 = vector.load %arg2[%c32, %c0_70, %c0_71] : memref<49x2x256xf32, #tpu.memory_space<vmem>>, vector<1x2x256xf32>
    %171 = vector.shape_cast %170 : vector<1x2x256xf32> to vector<2x256xf32>
    %172 = arith.mulf %171, %169 : vector<2x256xf32>
    %173 = arith.addf %168, %172 : vector<2x256xf32>
    %c238_i32 = arith.constant 238 : i32
    %174 = tpu.dynamic_rotate %8 by %c238_i32 dim 1 : vector<2x256xf32>, i32 -> vector<2x256xf32>
    %c33 = arith.constant 33 : index
    %c0_72 = arith.constant 0 : index
    %c0_73 = arith.constant 0 : index
    %175 = vector.load %arg2[%c33, %c0_72, %c0_73] : memref<49x2x256xf32, #tpu.memory_space<vmem>>, vector<1x2x256xf32>
    %176 = vector.shape_cast %175 : vector<1x2x256xf32> to vector<2x256xf32>
    %177 = arith.mulf %176, %174 : vector<2x256xf32>
    %178 = arith.addf %173, %177 : vector<2x256xf32>
    %c237_i32 = arith.constant 237 : i32
    %179 = tpu.dynamic_rotate %8 by %c237_i32 dim 1 : vector<2x256xf32>, i32 -> vector<2x256xf32>
    %c34 = arith.constant 34 : index
    %c0_74 = arith.constant 0 : index
    %c0_75 = arith.constant 0 : index
    %180 = vector.load %arg2[%c34, %c0_74, %c0_75] : memref<49x2x256xf32, #tpu.memory_space<vmem>>, vector<1x2x256xf32>
    %181 = vector.shape_cast %180 : vector<1x2x256xf32> to vector<2x256xf32>
    %182 = arith.mulf %181, %179 : vector<2x256xf32>
    %183 = arith.addf %178, %182 : vector<2x256xf32>
    %c227_i32 = arith.constant 227 : i32
    %184 = tpu.dynamic_rotate %8 by %c227_i32 dim 1 : vector<2x256xf32>, i32 -> vector<2x256xf32>
    %c35 = arith.constant 35 : index
    %c0_76 = arith.constant 0 : index
    %c0_77 = arith.constant 0 : index
    %185 = vector.load %arg2[%c35, %c0_76, %c0_77] : memref<49x2x256xf32, #tpu.memory_space<vmem>>, vector<1x2x256xf32>
    %186 = vector.shape_cast %185 : vector<1x2x256xf32> to vector<2x256xf32>
    %187 = arith.mulf %186, %184 : vector<2x256xf32>
    %188 = arith.addf %183, %187 : vector<2x256xf32>
    %c226_i32 = arith.constant 226 : i32
    %189 = tpu.dynamic_rotate %8 by %c226_i32 dim 1 : vector<2x256xf32>, i32 -> vector<2x256xf32>
    %c36 = arith.constant 36 : index
    %c0_78 = arith.constant 0 : index
    %c0_79 = arith.constant 0 : index
    %190 = vector.load %arg2[%c36, %c0_78, %c0_79] : memref<49x2x256xf32, #tpu.memory_space<vmem>>, vector<1x2x256xf32>
    %191 = vector.shape_cast %190 : vector<1x2x256xf32> to vector<2x256xf32>
    %192 = arith.mulf %191, %189 : vector<2x256xf32>
    %193 = arith.addf %188, %192 : vector<2x256xf32>
    %c225_i32 = arith.constant 225 : i32
    %194 = tpu.dynamic_rotate %8 by %c225_i32 dim 1 : vector<2x256xf32>, i32 -> vector<2x256xf32>
    %c37 = arith.constant 37 : index
    %c0_80 = arith.constant 0 : index
    %c0_81 = arith.constant 0 : index
    %195 = vector.load %arg2[%c37, %c0_80, %c0_81] : memref<49x2x256xf32, #tpu.memory_space<vmem>>, vector<1x2x256xf32>
    %196 = vector.shape_cast %195 : vector<1x2x256xf32> to vector<2x256xf32>
    %197 = arith.mulf %196, %194 : vector<2x256xf32>
    %198 = arith.addf %193, %197 : vector<2x256xf32>
    %c224_i32 = arith.constant 224 : i32
    %199 = tpu.dynamic_rotate %8 by %c224_i32 dim 1 : vector<2x256xf32>, i32 -> vector<2x256xf32>
    %c38 = arith.constant 38 : index
    %c0_82 = arith.constant 0 : index
    %c0_83 = arith.constant 0 : index
    %200 = vector.load %arg2[%c38, %c0_82, %c0_83] : memref<49x2x256xf32, #tpu.memory_space<vmem>>, vector<1x2x256xf32>
    %201 = vector.shape_cast %200 : vector<1x2x256xf32> to vector<2x256xf32>
    %202 = arith.mulf %201, %199 : vector<2x256xf32>
    %203 = arith.addf %198, %202 : vector<2x256xf32>
    %c223_i32 = arith.constant 223 : i32
    %204 = tpu.dynamic_rotate %8 by %c223_i32 dim 1 : vector<2x256xf32>, i32 -> vector<2x256xf32>
    %c39 = arith.constant 39 : index
    %c0_84 = arith.constant 0 : index
    %c0_85 = arith.constant 0 : index
    %205 = vector.load %arg2[%c39, %c0_84, %c0_85] : memref<49x2x256xf32, #tpu.memory_space<vmem>>, vector<1x2x256xf32>
    %206 = vector.shape_cast %205 : vector<1x2x256xf32> to vector<2x256xf32>
    %207 = arith.mulf %206, %204 : vector<2x256xf32>
    %208 = arith.addf %203, %207 : vector<2x256xf32>
    %c222_i32 = arith.constant 222 : i32
    %209 = tpu.dynamic_rotate %8 by %c222_i32 dim 1 : vector<2x256xf32>, i32 -> vector<2x256xf32>
    %c40 = arith.constant 40 : index
    %c0_86 = arith.constant 0 : index
    %c0_87 = arith.constant 0 : index
    %210 = vector.load %arg2[%c40, %c0_86, %c0_87] : memref<49x2x256xf32, #tpu.memory_space<vmem>>, vector<1x2x256xf32>
    %211 = vector.shape_cast %210 : vector<1x2x256xf32> to vector<2x256xf32>
    %212 = arith.mulf %211, %209 : vector<2x256xf32>
    %213 = arith.addf %208, %212 : vector<2x256xf32>
    %c221_i32 = arith.constant 221 : i32
    %214 = tpu.dynamic_rotate %8 by %c221_i32 dim 1 : vector<2x256xf32>, i32 -> vector<2x256xf32>
    %c41 = arith.constant 41 : index
    %c0_88 = arith.constant 0 : index
    %c0_89 = arith.constant 0 : index
    %215 = vector.load %arg2[%c41, %c0_88, %c0_89] : memref<49x2x256xf32, #tpu.memory_space<vmem>>, vector<1x2x256xf32>
    %216 = vector.shape_cast %215 : vector<1x2x256xf32> to vector<2x256xf32>
    %217 = arith.mulf %216, %214 : vector<2x256xf32>
    %218 = arith.addf %213, %217 : vector<2x256xf32>
    %c211_i32 = arith.constant 211 : i32
    %219 = tpu.dynamic_rotate %8 by %c211_i32 dim 1 : vector<2x256xf32>, i32 -> vector<2x256xf32>
    %c42 = arith.constant 42 : index
    %c0_90 = arith.constant 0 : index
    %c0_91 = arith.constant 0 : index
    %220 = vector.load %arg2[%c42, %c0_90, %c0_91] : memref<49x2x256xf32, #tpu.memory_space<vmem>>, vector<1x2x256xf32>
    %221 = vector.shape_cast %220 : vector<1x2x256xf32> to vector<2x256xf32>
    %222 = arith.mulf %221, %219 : vector<2x256xf32>
    %223 = arith.addf %218, %222 : vector<2x256xf32>
    %c210_i32 = arith.constant 210 : i32
    %224 = tpu.dynamic_rotate %8 by %c210_i32 dim 1 : vector<2x256xf32>, i32 -> vector<2x256xf32>
    %c43 = arith.constant 43 : index
    %c0_92 = arith.constant 0 : index
    %c0_93 = arith.constant 0 : index
    %225 = vector.load %arg2[%c43, %c0_92, %c0_93] : memref<49x2x256xf32, #tpu.memory_space<vmem>>, vector<1x2x256xf32>
    %226 = vector.shape_cast %225 : vector<1x2x256xf32> to vector<2x256xf32>
    %227 = arith.mulf %226, %224 : vector<2x256xf32>
    %228 = arith.addf %223, %227 : vector<2x256xf32>
    %c209_i32 = arith.constant 209 : i32
    %229 = tpu.dynamic_rotate %8 by %c209_i32 dim 1 : vector<2x256xf32>, i32 -> vector<2x256xf32>
    %c44 = arith.constant 44 : index
    %c0_94 = arith.constant 0 : index
    %c0_95 = arith.constant 0 : index
    %230 = vector.load %arg2[%c44, %c0_94, %c0_95] : memref<49x2x256xf32, #tpu.memory_space<vmem>>, vector<1x2x256xf32>
    %231 = vector.shape_cast %230 : vector<1x2x256xf32> to vector<2x256xf32>
    %232 = arith.mulf %231, %229 : vector<2x256xf32>
    %233 = arith.addf %228, %232 : vector<2x256xf32>
    %c208_i32 = arith.constant 208 : i32
    %234 = tpu.dynamic_rotate %8 by %c208_i32 dim 1 : vector<2x256xf32>, i32 -> vector<2x256xf32>
    %c45 = arith.constant 45 : index
    %c0_96 = arith.constant 0 : index
    %c0_97 = arith.constant 0 : index
    %235 = vector.load %arg2[%c45, %c0_96, %c0_97] : memref<49x2x256xf32, #tpu.memory_space<vmem>>, vector<1x2x256xf32>
    %236 = vector.shape_cast %235 : vector<1x2x256xf32> to vector<2x256xf32>
    %237 = arith.mulf %236, %234 : vector<2x256xf32>
    %238 = arith.addf %233, %237 : vector<2x256xf32>
    %c207_i32 = arith.constant 207 : i32
    %239 = tpu.dynamic_rotate %8 by %c207_i32 dim 1 : vector<2x256xf32>, i32 -> vector<2x256xf32>
    %c46 = arith.constant 46 : index
    %c0_98 = arith.constant 0 : index
    %c0_99 = arith.constant 0 : index
    %240 = vector.load %arg2[%c46, %c0_98, %c0_99] : memref<49x2x256xf32, #tpu.memory_space<vmem>>, vector<1x2x256xf32>
    %241 = vector.shape_cast %240 : vector<1x2x256xf32> to vector<2x256xf32>
    %242 = arith.mulf %241, %239 : vector<2x256xf32>
    %243 = arith.addf %238, %242 : vector<2x256xf32>
    %c206_i32 = arith.constant 206 : i32
    %244 = tpu.dynamic_rotate %8 by %c206_i32 dim 1 : vector<2x256xf32>, i32 -> vector<2x256xf32>
    %c47 = arith.constant 47 : index
    %c0_100 = arith.constant 0 : index
    %c0_101 = arith.constant 0 : index
    %245 = vector.load %arg2[%c47, %c0_100, %c0_101] : memref<49x2x256xf32, #tpu.memory_space<vmem>>, vector<1x2x256xf32>
    %246 = vector.shape_cast %245 : vector<1x2x256xf32> to vector<2x256xf32>
    %247 = arith.mulf %246, %244 : vector<2x256xf32>
    %248 = arith.addf %243, %247 : vector<2x256xf32>
    %c205_i32 = arith.constant 205 : i32
    %249 = tpu.dynamic_rotate %8 by %c205_i32 dim 1 : vector<2x256xf32>, i32 -> vector<2x256xf32>
    %c48 = arith.constant 48 : index
    %c0_102 = arith.constant 0 : index
    %c0_103 = arith.constant 0 : index
    %250 = vector.load %arg2[%c48, %c0_102, %c0_103] : memref<49x2x256xf32, #tpu.memory_space<vmem>>, vector<1x2x256xf32>
    %251 = vector.shape_cast %250 : vector<1x2x256xf32> to vector<2x256xf32>
    %252 = arith.mulf %251, %249 : vector<2x256xf32>
    %253 = arith.addf %248, %252 : vector<2x256xf32>
    %254 = vector.extract_strided_slice %253 {offsets = [0, 0], sizes = [1, 256], strides = [1, 1]} : vector<2x256xf32> to vector<1x256xf32>
    %255 = vector.extract_strided_slice %253 {offsets = [1, 0], sizes = [1, 256], strides = [1, 1]} : vector<2x256xf32> to vector<1x256xf32>
    %256 = arith.addf %254, %255 : vector<1x256xf32>
    %cst_104 = arith.constant 0.000000e+00 : f32
    %257 = vector.broadcast %cst_104 : f32 to vector<1x256xf32>
    %258 = arith.subf %257, %256 : vector<1x256xf32>
    %259 = math.exp %258 : vector<1x256xf32>
    %cst_105 = arith.constant 1.000000e+00 : f32
    %260 = vector.broadcast %cst_105 : f32 to vector<1x256xf32>
    %261 = arith.addf %260, %259 : vector<1x256xf32>
    %262 = tpu.reciprocal %261 {approx = true} : vector<1x256xf32> -> vector<1x256xf32>
    %c0_106 = arith.constant 0 : index
    %c0_107 = arith.constant 0 : index
    %c0_108 = arith.constant 0 : index
    %263 = vector.load %arg1[%c0_106, %c0_107, %c0_108] : memref<1x4x256xf32, #tpu.memory_space<vmem>>, vector<1x4x256xf32>
    %264 = vector.shape_cast %263 : vector<1x4x256xf32> to vector<4x256xf32>
    %265 = vector.broadcast %262 : vector<1x256xf32> to vector<4x256xf32>
    %266 = arith.mulf %264, %265 : vector<4x256xf32>
    %c0_109 = arith.constant 0 : index
    %c0_110 = arith.constant 0 : index
    %c0_111 = arith.constant 0 : index
    %267 = vector.load %arg3[%c0_109, %c0_110, %c0_111] : memref<1x4x256xf32, #tpu.memory_space<vmem>>, vector<1x4x256xf32>
    %268 = vector.shape_cast %267 : vector<1x4x256xf32> to vector<4x256xf32>
    %269 = vector.shape_cast %266 : vector<4x256xf32> to vector<1x4x256xf32>
    tpu.vector_store %arg3[%c0_109, %c0_110, %c0_111], %269 {strides = array<i32>} : memref<1x4x256xf32, #tpu.memory_space<vmem>>, vector<1x4x256xf32>,
    return
  }
  func.func @transform_0(%arg0: i32) -> (i32, i32, i32) {
    %c0_i32 = arith.constant 0 : i32
    %c0_i32_0 = arith.constant 0 : i32
    %c0_i32_1 = arith.constant 0 : i32
    return %arg0, %c0_i32, %c0_i32_0 : i32, i32, i32
  }
  func.func @transform_1(%arg0: i32) -> (i32, i32, i32) {
    %c0_i32 = arith.constant 0 : i32
    %c0_i32_0 = arith.constant 0 : i32
    %c0_i32_1 = arith.constant 0 : i32
    %c0_i32_2 = arith.constant 0 : i32
    return %c0_i32, %c0_i32_0, %c0_i32_1 : i32, i32, i32
  }
  func.func @transform_2(%arg0: i32) -> (i32, i32, i32) {
    %c0_i32 = arith.constant 0 : i32
    %c0_i32_0 = arith.constant 0 : i32
    %c0_i32_1 = arith.constant 0 : i32
    return %arg0, %c0_i32, %c0_i32_0 : i32, i32, i32
  }
}

</mosaic_0001>

<bundles_post_ra>
// kernel: cbam_forward.1
= control target key start
LH: loop header
LB: loop body
LE: loop exit
PB: predicated region body
PF: predicated region fallthrough
CT: control target
= control target key end

     0   :  { %s1542_s9 = smov 0   ;;  %s2088_s0 = inlined_call_operand.vmem [shape: f32[2,4,256], index: 0, kind: input, shape index: {}]   ;;  %s2089_s1 = inlined_call_operand.vmem [shape: f32[49,2,256], index: 1, kind: input, shape index: {}]   ;;  %s2090_s2 = inlined_call_operand.vmem [shape: f32[2,4,256], index: 2, kind: output, shape index: {}]  }
   0x1 LB: > { %s1345_s10 = sadd.s32 4294967295, %s1476_s9   ;;  %p1349_p0 = scmp.ge.s32.totalorder %s1476_s9, 1  ;;  %s1476_s9 = sphi %s1542_s9, %s12_s9  }
   0x2   : > { %p112_p1 = scmp.lt.s32.totalorder %s1476_s9, 3 }
   0x4   : > { %p113_p2 = pnand %p1349_p0, %p112_p1 }
   0x5   : > { %p134_p3 = scmp.lt.s32.totalorder (!%p113_p2), %s1345_s10, 1  ;;  %vm148_vm0 = vcmask (!%p113_p2), 1043456   ;;  %vm180_vm1 = vcmask (!%p113_p2), 1040384   ;;  %s1478_s15 = smov (!%p113_p2), 50   ;;  %v187_v34 = vlaneseq (!%p113_p2)  ;;  %v1510_v52 = vmov (!%p113_p2), 1983009808  }
   0x6   : > { %116 = sbr.rel (%p113_p2) target bundleno = 386 (0x182), region = 28  ;;  %s1479_s16 = smov (!%p113_p2), 51   ;;  %v197_v53 = vunpack.c.l.s4 (!%p113_p2), %v1510_v52 }
   0x7   : > { %s1480_s17 = smov (!%p113_p2), 49   ;;  %s1481_s18 = smov (!%p113_p2), 48   ;;  %v1623_v35 = vand.u32 (!%p113_p2), 127, %v187_v34  ;;  %v1637_v60 = vshrl.u32 (!%p113_p2), %v187_v34, 7 }
   0x8   : > { %s1482_s19 = smov (!%p113_p2), 47   ;;  %s1483_s20 = smov (!%p113_p2), 46   ;;  %v198_v59 = vunpack.c.0.s8 (!%p113_p2), %v197_v53 }
   0x9   : > { %s1484_s21 = smov (!%p113_p2), 45   ;;  %s1485_s22 = smov (!%p113_p2), 35   ;;  %vm210_vm2 = vcmp.lt.s32.totalorder (!%p113_p2), %v1623_v35, 50  ;;  %vm232_vm3 = vcmp.lt.s32.totalorder (!%p113_p2), %v1623_v35, 49  ;;  %vm254_vm4 = vcmp.lt.s32.totalorder (!%p113_p2), %v1623_v35, 48  ;;  %vm276_vm5 = vcmp.lt.s32.totalorder (!%p113_p2), %v1623_v35, 47 }
   0xa   : > { %s1486_s23 = smov (!%p113_p2), 34   ;;  %s1487_s24 = smov (!%p113_p2), 33   ;;  %vm298_vm6 = vcmp.lt.s32.totalorder (!%p113_p2), %v1623_v35, 46  ;;  %vm320_vm7 = vcmp.lt.s32.totalorder (!%p113_p2), %v1623_v35, 45  ;;  %vm189_vm8 = vcmp.lt.s32.totalorder (!%p113_p2), %v1623_v35, 51  ;;  %vm342_vm9 = vcmp.lt.s32.totalorder (!%p113_p2), %v1623_v35, 35 }
   0xb   : > { %s1488_s25 = smov (!%p113_p2), 32   ;;  %s1489_s26 = smov (!%p113_p2), 31   ;;  %vm364_vm10 = vcmp.lt.s32.totalorder (!%p113_p2), %v1623_v35, 34  ;;  %vm386_vm11 = vcmp.lt.s32.totalorder (!%p113_p2), %v1623_v35, 33  ;;  %vm408_vm12 = vcmp.lt.s32.totalorder (!%p113_p2), %v1623_v35, 32  ;;  %vm430_vm13 = vcmp.lt.s32.totalorder (!%p113_p2), %v1623_v35, 31 }
   0xc   : > { %s1490_s27 = smov (!%p113_p2), 30   ;;  %s1491_s28 = smov (!%p113_p2), 29   ;;  %vm452_vm14 = vcmp.lt.s32.totalorder (!%p113_p2), %v1623_v35, 30  ;;  %vm474_vm15 = vcmp.lt.s32.totalorder (!%p113_p2), %v1623_v35, 29 }
   0xd   : > { %s2092_s10 = smov (!%p134_p3, %s1345_s10), 1  ;;  %s1492_s29 = smov 19  }
   0xe   : > { %s1405_s11 = sshll.u32 %s2092_s10, 3  ;;  %s1493_s30 = smov 18  }
   0xf   : > { %s1558_s14 = scalar_lea.vmem %s2088_s0, %s1405_s11  ;;  %s1494_s3 = smov 17  }
  0x10   : > { %v144_v0 = vld [vmem:[%s1558_s14] sm:$0xff]  ;;  %s1495_s4 = smov 16   ;;  %s1496_s5 = smov 15  }
  0x11   : > { %v149_v1 = vsel %vm148_vm0, %v144_v0, -inf  ;;  %v163_v2 = vsel %vm148_vm0, %v144_v0, 0.0  ;;  %v146_v3 = vcombine.high %v144_v0, %v144_v0  ;;  %s1497_s6 = smov 14   ;;  %s1498_s7 = smov 13  }
  0x12   : > { %v150_v4 = vrot.slane %v149_v1, 4  ;;  %v164_v5 = vrot.slane %v163_v2, 4  ;;  %s1499_s8 = smov 3   ;;  %s1500_s12 = smov 2  }
  0x13   : > { %v156_v6 = vsel %vm148_vm0, %v146_v3, -inf  ;;  %v170_v7 = vsel %vm148_vm0, %v146_v3, 0.0  ;;  %s1501_s13 = smov 1   ;;  %vm496_vm0 = vcmp.lt.s32.totalorder %v1623_v35, 19 }
  0x14   : > { %v151_v8 = vmax.f32 %v149_v1, %v150_v4  ;;  %v165_v9 = vadd.f32 %v164_v5, %v163_v2  ;;  %v157_v10 = vrot.slane %v156_v6, 4  ;;  %v171_v11 = vrot.slane %v170_v7, 4 }
  0x15   : > { %v1643_v2 = vsub.s32 %v198_v59, %v1637_v60 }
  0x16   : > { %v152_v12 = vrot.slane %v151_v8, 2  ;;  %v166_v13 = vrot.slane %v165_v9, 2  ;;  %v158_v14 = vmax.f32 %v156_v6, %v157_v10  ;;  %v172_v15 = vadd.f32 %v171_v11, %v170_v7 }
  0x18   : > { %v153_v16 = vmax.f32 %v151_v8, %v152_v12  ;;  %v167_v17 = vadd.f32 %v166_v13, %v165_v9  ;;  %v159_v18 = vrot.slane %v158_v14, 2  ;;  %v173_v19 = vrot.slane %v172_v15, 2  ;;  %v1354_v13 = vld [vmem:[%s2089_s1 + $0x4] sm:$0xf] }
  0x1a   : > { %v154_v20 = vrot.slane %v153_v16, 1  ;;  %v168_v21 = vrot.slane %v167_v17, 1  ;;  %v160_v22 = vmax.f32 %v158_v14, %v159_v18  ;;  %v174_v23 = vadd.f32 %v173_v19, %v172_v15  ;;  %v192_v14 = vld [vmem:[%s2089_s1] sm:$0xf]  ;;  %v1355_v19 = vld [vmem:[%s2089_s1 + $0x8] sm:$0xf] }
  0x1c   : > { %v155_v24 = vmax.f32 %v153_v16, %v154_v20  ;;  %v169_v25 = vadd.f32 %v168_v21, %v167_v17  ;;  %v161_v26 = vrot.slane %v160_v22, 1  ;;  %v175_v27 = vrot.slane %v174_v23, 1 }
  0x1e   : > { %v178_v28 = vmul.f32 0.25, %v169_v25  ;;  %v162_v29 = vmax.f32 %v160_v22, %v161_v26  ;;  %v176_v30 = vadd.f32 %v175_v27, %v174_v23 }
  0x20   : > { %v1561_v31 = vsel %vm180_vm1, %v155_v24, %v178_v28  ;;  %v179_v32 = vmul.f32 0.25, %v176_v30  ;;  %v1356_v24 = vld [vmem:[%s2089_s1 + $0xc] sm:$0xf] }
  0x21   : > { %206 = vrot.lane.b32.xlu1 %v1561_v31, %s1478_s15  ;;  %183 = vrot.lane.b32.xlu0 %v1561_v31, %s1479_s16 }
  0x22   : > { %v1565_v33 = vsel %vm180_vm1, %v162_v29, %v179_v32  ;;  %vm518_vm1 = vcmp.lt.s32.totalorder %v1623_v35, 18 }
  0x25   : > { %228 = vrot.lane.b32.xlu0 %v1561_v31, %s1480_s17  ;;  %208 = vrot.lane.b32.xlu1 %v1565_v33, %s1478_s15  ;;  %s1502_s15 = smov 127  }
  0x29   : > { %250 = vrot.lane.b32.xlu0 %v1561_v31, %s1481_s18  ;;  %230 = vrot.lane.b32.xlu1 %v1565_v33, %s1480_s17  ;;  %s1504_s17 = smov 125  }
  0x2d   : > { %272 = vrot.lane.b32.xlu0 %v1561_v31, %s1482_s19  ;;  %252 = vrot.lane.b32.xlu1 %v1565_v33, %s1481_s18  ;;  %s1505_s18 = smov 115  }
  0x31   : > { %294 = vrot.lane.b32.xlu0 %v1561_v31, %s1483_s20  ;;  %274 = vrot.lane.b32.xlu1 %v1565_v33, %s1482_s19  ;;  %s1506_s19 = smov 114  }
  0x35   : > { %316 = vrot.lane.b32.xlu0 %v1561_v31, %s1484_s21  ;;  %296 = vrot.lane.b32.xlu1 %v1565_v33, %s1483_s20  ;;  %s1507_s20 = smov 113  }
  0x39   : > { %318 = vrot.lane.b32.xlu1 %v1565_v33, %s1484_s21  ;;  %185 = vrot.lane.b32.xlu0 %v1565_v33, %s1479_s16  ;;  %s1503_s16 = smov 126   ;;  %s1508_s21 = smov 112  }
  0x3d   : > { %340 = vrot.lane.b32.xlu1 %v1565_v33, %s1485_s22  ;;  %338 = vrot.lane.b32.xlu0 %v1561_v31, %s1485_s22  ;;  %s1509_s22 = smov 111  }
  0x41   : > { %362 = vrot.lane.b32.xlu1 %v1565_v33, %s1486_s23  ;;  %360 = vrot.lane.b32.xlu0 %v1561_v31, %s1486_s23  ;;  %s1511_s23 = smov 110  }
  0x45   : > { %384 = vrot.lane.b32.xlu1 %v1565_v33, %s1487_s24  ;;  %382 = vrot.lane.b32.xlu0 %v1561_v31, %s1487_s24  ;;  %s1512_s24 = smov 109  }
  0x49   : > { %406 = vrot.lane.b32.xlu1 %v1565_v33, %s1488_s25  ;;  %404 = vrot.lane.b32.xlu0 %v1561_v31, %s1488_s25  ;;  %s1513_s25 = smov 99  }
  0x4d   : > { %428 = vrot.lane.b32.xlu1 %v1565_v33, %s1489_s26  ;;  %426 = vrot.lane.b32.xlu0 %v1561_v31, %s1489_s26  ;;  %s1514_s26 = smov 98  }
  0x51   : > { %450 = vrot.lane.b32.xlu1 %v1565_v33, %s1490_s27  ;;  %448 = vrot.lane.b32.xlu0 %v1561_v31, %s1490_s27 }
  0x55   : > { %472 = vrot.lane.b32.xlu1 %v1565_v33, %s1491_s28  ;;  %470 = vrot.lane.b32.xlu0 %v1561_v31, %s1491_s28 }
  0x59   : > { %494 = vrot.lane.b32.xlu1 %v1565_v33, %s1492_s29  ;;  %492 = vrot.lane.b32.xlu0 %v1561_v31, %s1492_s29  ;;  %s1519_s29 = smov 93  }
  0x5d   : > { %516 = vrot.lane.b32.xlu1 %v1565_v33, %s1493_s30  ;;  %514 = vrot.lane.b32.xlu0 %v1561_v31, %s1493_s30 }
  0x61   : > { %538 = vrot.lane.b32.xlu1 %v1565_v33, %s1494_s3  ;;  %536 = vrot.lane.b32.xlu0 %v1561_v31, %s1494_s3 }
  0x65   : > { %560 = vrot.lane.b32.xlu1 %v1565_v33, %s1495_s4  ;;  %558 = vrot.lane.b32.xlu0 %v1561_v31, %s1495_s4  ;;  %s1520_s4 = smov 83  }
  0x69   : > { %582 = vrot.lane.b32.xlu1 %v1565_v33, %s1496_s5  ;;  %580 = vrot.lane.b32.xlu0 %v1561_v31, %s1496_s5 }
  0x6d   : > { %604 = vrot.lane.b32.xlu1 %v1565_v33, %s1497_s6  ;;  %602 = vrot.lane.b32.xlu0 %v1561_v31, %s1497_s6 }
  0x71   : > { %626 = vrot.lane.b32.xlu1 %v1565_v33, %s1498_s7  ;;  %624 = vrot.lane.b32.xlu0 %v1561_v31, %s1498_s7  ;;  %s1515_s7 = smov 97  }
  0x75   : > { %648 = vrot.lane.b32.xlu1 %v1565_v33, %s1499_s8  ;;  %646 = vrot.lane.b32.xlu0 %v1561_v31, %s1499_s8 }
  0x79   : > { %670 = vrot.lane.b32.xlu1 %v1565_v33, %s1500_s12  ;;  %668 = vrot.lane.b32.xlu0 %v1561_v31, %s1500_s12 }
  0x7d   : > { %692 = vrot.lane.b32.xlu1 %v1565_v33, %s1501_s13  ;;  %690 = vrot.lane.b32.xlu0 %v1561_v31, %s1501_s13  ;;  %s1516_s13 = smov 96  }
  0x81   : > { %729 = vrot.lane.b32.xlu1 %v1565_v33, %s1502_s15  ;;  %727 = vrot.lane.b32.xlu0 %v1561_v31, %s1502_s15 }
  0x85   : > { %751 = vrot.lane.b32.xlu1 %v1565_v33, %s1503_s16  ;;  %749 = vrot.lane.b32.xlu0 %v1561_v31, %s1503_s16 }
  0x89   : > { %773 = vrot.lane.b32.xlu1 %v1565_v33, %s1504_s17  ;;  %771 = vrot.lane.b32.xlu0 %v1561_v31, %s1504_s17  ;;  %s1523_s17 = smov 80  }
  0x8d   : > { %795 = vrot.lane.b32.xlu1 %v1565_v33, %s1505_s18  ;;  %793 = vrot.lane.b32.xlu0 %v1561_v31, %s1505_s18  ;;  %s1524_s18 = smov 79  }
  0x91   : > { %817 = vrot.lane.b32.xlu1 %v1565_v33, %s1506_s19  ;;  %815 = vrot.lane.b32.xlu0 %v1561_v31, %s1506_s19  ;;  %s1525_s19 = smov 78  }
  0x93   : > { %v207_v36 = vpop.permute.xlu1 %206  ;;  %v184_v37 = vpop.permute.xlu0 %183 }
  0x95   : > { %839 = vrot.lane.b32.xlu1 %v1565_v33, %s1507_s20  ;;  %837 = vrot.lane.b32.xlu0 %v1561_v31, %s1507_s20  ;;  %s1526_s20 = smov 77  }
  0x97   : > { %v229_v38 = vpop.permute.xlu0 %228  ;;  %v209_v39 = vpop.permute.xlu1 %208 }
  0x98   : > { %v211_v40 = vsel %vm210_vm2, %v207_v36, %v209_v39  ;;  %v212_v41 = vsel %vm210_vm2, %v209_v39, %v207_v36  ;;  %v1357_v36 = vld [vmem:[%s2089_s1 + $0x10] sm:$0xf]  ;;  %vm540_vm2 = vcmp.lt.s32.totalorder %v1623_v35, 17 }
  0x99   : > { %v217_v42 = vcombine.low %v212_v41, %v211_v40  ;;  %861 = vrot.lane.b32.xlu1 %v1565_v33, %s1508_s21  ;;  %859 = vrot.lane.b32.xlu0 %v1561_v31, %s1508_s21  ;;  %s1517_s21 = smov 95  }
  0x9b   : > { %v251_v43 = vpop.permute.xlu0 %250  ;;  %v231_v44 = vpop.permute.xlu1 %230  ;;  %v224_v10 = vrot.slane %v217_v42, %v1643_v2  ;;  %v1358_v42 = vld [vmem:[%s2089_s1 + $0x14] sm:$0xf] }
  0x9c   : > { %v233_v45 = vsel %vm232_vm3, %v229_v38, %v231_v44  ;;  %v234_v46 = vsel %vm232_vm3, %v231_v44, %v229_v38  ;;  %vm562_vm3 = vcmp.lt.s32.totalorder %v1623_v35, 16 }
  0x9d   : > { %v239_v47 = vcombine.low %v234_v46, %v233_v45  ;;  %883 = vrot.lane.b32.xlu1 %v1565_v33, %s1509_s22  ;;  %881 = vrot.lane.b32.xlu0 %v1561_v31, %s1509_s22  ;;  %v226_v23 = vmul.f32 %v1354_v13, %v224_v10 }
  0x9f   : > { %v273_v48 = vpop.permute.xlu0 %272  ;;  %v253_v49 = vpop.permute.xlu1 %252  ;;  %v246_v15 = vrot.slane %v239_v47, %v1643_v2 }
  0xa0   : > { %v255_v50 = vsel %vm254_vm4, %v251_v43, %v253_v49  ;;  %v256_v51 = vsel %vm254_vm4, %v253_v49, %v251_v43  ;;  %vm584_vm4 = vcmp.lt.s32.totalorder %v1623_v35, 15 }
  0xa1   : > { %v261_v54 = vcombine.low %v256_v51, %v255_v50  ;;  %905 = vrot.lane.b32.xlu1 %v1565_v33, %s1511_s23  ;;  %903 = vrot.lane.b32.xlu0 %v1561_v31, %s1511_s23  ;;  %v248_v27 = vmul.f32 %v1355_v19, %v246_v15 }
  0xa3   : > { %v295_v55 = vpop.permute.xlu0 %294  ;;  %v275_v56 = vpop.permute.xlu1 %274  ;;  %v268_v20 = vrot.slane %v261_v54, %v1643_v2  ;;  %v1360_v54 = vld [vmem:[%s2089_s1 + $0x1c] sm:$0xf] }
  0xa4   : > { %v277_v57 = vsel %vm276_vm5, %v273_v48, %v275_v56  ;;  %v278_v58 = vsel %vm276_vm5, %v275_v56, %v273_v48  ;;  %v1359_v48 = vld [vmem:[%s2089_s1 + $0x18] sm:$0xf]  ;;  %vm606_vm5 = vcmp.lt.s32.totalorder %v1623_v35, 14 }
  0xa5   : > { %v283_v61 = vcombine.low %v278_v58, %v277_v57  ;;  %927 = vrot.lane.b32.xlu1 %v1565_v33, %s1512_s24  ;;  %925 = vrot.lane.b32.xlu0 %v1561_v31, %s1512_s24  ;;  %v270_v34 = vmul.f32 %v1356_v24, %v268_v20  ;;  %s1518_s24 = smov 94  }
  0xa7   : > { %v317_v62 = vpop.permute.xlu0 %316  ;;  %v297_v63 = vpop.permute.xlu1 %296  ;;  %v290_v28 = vrot.slane %v283_v61, %v1643_v2 }
  0xa8   : > { %v299_v0 = vsel %vm298_vm6, %v295_v55, %v297_v63  ;;  %v300_v1 = vsel %vm298_vm6, %v297_v63, %v295_v55  ;;  %v1361_v63 = vld [vmem:[%s2089_s1 + $0x20] sm:$0xf]  ;;  %vm628_vm6 = vcmp.lt.s32.totalorder %v1623_v35, 13 }
  0xa9   : > { %v305_v3 = vcombine.low %v300_v1, %v299_v0  ;;  %949 = vrot.lane.b32.xlu1 %v1565_v33, %s1513_s25  ;;  %947 = vrot.lane.b32.xlu0 %v1561_v31, %s1513_s25  ;;  %v292_v43 = vmul.f32 %v1357_v36, %v290_v28 }
  0xab   : > { %v319_v4 = vpop.permute.xlu1 %318  ;;  %v186_v5 = vpop.permute.xlu0 %185  ;;  %v312_v39 = vrot.slane %v305_v3, %v1643_v2 }
  0xac   : > { %v321_v6 = vsel %vm320_vm7, %v317_v62, %v319_v4  ;;  %v322_v7 = vsel %vm320_vm7, %v319_v4, %v317_v62  ;;  %v190_v8 = vsel %vm189_vm8, %v184_v37, %v186_v5  ;;  %v191_v9 = vsel %vm189_vm8, %v186_v5, %v184_v37 }
  0xad   : > { %v327_v11 = vcombine.low %v322_v7, %v321_v6  ;;  %v195_v12 = vcombine.low %v191_v9, %v190_v8  ;;  %971 = vrot.lane.b32.xlu1 %v1565_v33, %s1514_s26  ;;  %969 = vrot.lane.b32.xlu0 %v1561_v31, %s1514_s26  ;;  %v314_v52 = vmul.f32 %v1358_v42, %v312_v39  ;;  %v1362_v6 = vld [vmem:[%s2089_s1 + $0x24] sm:$0xf]  ;;  %vm650_vm7 = vcmp.lt.s32.totalorder %v1623_v35, 3 }
  0xae   : > { %vm672_vm8 = vcmp.lt.s32.totalorder %v1623_v35, 2 }
  0xaf   : > { %v202_v16 = vrot.slane %v195_v12, %v1643_v2  ;;  %v341_v17 = vpop.permute.xlu1 %340  ;;  %v339_v18 = vpop.permute.xlu0 %338  ;;  %v334_v44 = vrot.slane %v327_v11, %v1643_v2  ;;  %v1363_v12 = vld [vmem:[%s2089_s1 + $0x28] sm:$0xf] }
  0xb0   : > { %v343_v21 = vsel %vm342_vm9, %v339_v18, %v341_v17  ;;  %v344_v22 = vsel %vm342_vm9, %v341_v17, %v339_v18  ;;  %v1364_v18 = vld [vmem:[%s2089_s1 + $0x2c] sm:$0xf]  ;;  %vm694_vm9 = vcmp.lt.s32.totalorder %v1623_v35, 1 }
  0xb1   : > { %v204_v25 = vmul.f32 %v202_v16, %v192_v14  ;;  %v349_v26 = vcombine.low %v344_v22, %v343_v21  ;;  %993 = vrot.lane.b32.xlu1 %v1565_v33, %s1515_s7  ;;  %991 = vrot.lane.b32.xlu0 %v1561_v31, %s1515_s7  ;;  %v336_v56 = vmul.f32 %v1359_v48, %v334_v44  ;;  %s1521_s7 = smov 82  }
  0xb3   : > { %v227_v29 = vadd.f32 %v226_v23, %v204_v25  ;;  %v363_v30 = vpop.permute.xlu1 %362  ;;  %v361_v32 = vpop.permute.xlu0 %360  ;;  %v356_v49 = vrot.slane %v349_v26, %v1643_v2 }
  0xb4   : > { %v365_v37 = vsel %vm364_vm10, %v361_v32, %v363_v30  ;;  %v366_v38 = vsel %vm364_vm10, %v363_v30, %v361_v32  ;;  %vm731_vm10 = vcmp.lt.s32.totalorder %v1623_v35, 127 }
  0xb5   : > { %v249_v40 = vadd.f32 %v248_v27, %v227_v29  ;;  %v371_v41 = vcombine.low %v366_v38, %v365_v37  ;;  %1015 = vrot.lane.b32.xlu1 %v1565_v33, %s1516_s13  ;;  %1013 = vrot.lane.b32.xlu0 %v1561_v31, %s1516_s13  ;;  %v358_v62 = vmul.f32 %v1360_v54, %v356_v49  ;;  %v1365_v29 = vld [vmem:[%s2089_s1 + $0x30] sm:$0xf]  ;;  %s1522_s13 = smov 81  }
  0xb7   : > { %v271_v45 = vadd.f32 %v270_v34, %v249_v40  ;;  %v385_v46 = vpop.permute.xlu1 %384  ;;  %v383_v47 = vpop.permute.xlu0 %382  ;;  %v378_v58 = vrot.slane %v371_v41, %v1643_v2  ;;  %v1366_v41 = vld [vmem:[%s2089_s1 + $0x34] sm:$0xf] }
  0xb8   : > { %v387_v50 = vsel %vm386_vm11, %v383_v47, %v385_v46  ;;  %v388_v51 = vsel %vm386_vm11, %v385_v46, %v383_v47  ;;  %vm753_vm11 = vcmp.lt.s32.totalorder %v1623_v35, 126 }
  0xb9   : > { %v293_v53 = vadd.f32 %v292_v43, %v271_v45  ;;  %v393_v55 = vcombine.low %v388_v51, %v387_v50  ;;  %1037 = vrot.lane.b32.xlu1 %v1565_v33, %s1517_s21  ;;  %1035 = vrot.lane.b32.xlu0 %v1561_v31, %s1517_s21  ;;  %v380_v8 = vmul.f32 %v1361_v63, %v378_v58  ;;  %v1367_v50 = vld [vmem:[%s2089_s1 + $0x38] sm:$0xf] }
  0xbb   : > { %v315_v57 = vadd.f32 %v314_v52, %v293_v53  ;;  %v407_v59 = vpop.permute.xlu1 %406  ;;  %v405_v61 = vpop.permute.xlu0 %404  ;;  %v400_v4 = vrot.slane %v393_v55, %v1643_v2 }
  0xbc   : > { %v409_v0 = vsel %vm408_vm12, %v405_v61, %v407_v59  ;;  %v410_v1 = vsel %vm408_vm12, %v407_v59, %v405_v61  ;;  %vm775_vm12 = vcmp.lt.s32.totalorder %v1623_v35, 125 }
  0xbd   : > { %v337_v3 = vadd.f32 %v336_v56, %v315_v57  ;;  %v415_v5 = vcombine.low %v410_v1, %v409_v0  ;;  %1059 = vrot.lane.b32.xlu1 %v1565_v33, %s1518_s24  ;;  %1057 = vrot.lane.b32.xlu0 %v1561_v31, %s1518_s24  ;;  %v402_v16 = vmul.f32 %v1362_v6, %v400_v4 }
  0xbf   : > { %v359_v7 = vadd.f32 %v358_v62, %v337_v3  ;;  %v422_v9 = vrot.slane %v415_v5, %v1643_v2  ;;  %v429_v10 = vpop.permute.xlu1 %428  ;;  %v427_v11 = vpop.permute.xlu0 %426 }
  0xc0   : > { %v431_v13 = vsel %vm430_vm13, %v427_v11, %v429_v10  ;;  %v432_v14 = vsel %vm430_vm13, %v429_v10, %v427_v11  ;;  %vm797_vm13 = vcmp.lt.s32.totalorder %v1623_v35, 115 }
  0xc1   : > { %v381_v15 = vadd.f32 %v380_v8, %v359_v7  ;;  %v437_v17 = vcombine.low %v432_v14, %v431_v13  ;;  %1081 = vrot.lane.b32.xlu1 %v1565_v33, %s1519_s29  ;;  %1079 = vrot.lane.b32.xlu0 %v1561_v31, %s1519_s29  ;;  %v424_v20 = vmul.f32 %v1363_v12, %v422_v9 }
  0xc3   : > { %v403_v19 = vadd.f32 %v402_v16, %v381_v15  ;;  %v444_v21 = vrot.slane %v437_v17, %v1643_v2  ;;  %v451_v22 = vpop.permute.xlu1 %450  ;;  %v449_v23 = vpop.permute.xlu0 %448 }
  0xc4   : > { %v453_v24 = vsel %vm452_vm14, %v449_v23, %v451_v22  ;;  %v454_v25 = vsel %vm452_vm14, %v451_v22, %v449_v23  ;;  %vm819_vm14 = vcmp.lt.s32.totalorder %v1623_v35, 114 }
  0xc5   : > { %v425_v26 = vadd.f32 %v424_v20, %v403_v19  ;;  %v446_v27 = vmul.f32 %v1364_v18, %v444_v21  ;;  %v459_v28 = vcombine.low %v454_v25, %v453_v24  ;;  %1103 = vrot.lane.b32.xlu1 %v1565_v33, %s1520_s4  ;;  %1101 = vrot.lane.b32.xlu0 %v1561_v31, %s1520_s4 }
  0xc7   : > { %v447_v30 = vadd.f32 %v446_v27, %v425_v26  ;;  %v466_v32 = vrot.slane %v459_v28, %v1643_v2  ;;  %v473_v34 = vpop.permute.xlu1 %472  ;;  %v471_v36 = vpop.permute.xlu0 %470 }
  0xc8   : > { %v475_v37 = vsel %vm474_vm15, %v471_v36, %v473_v34  ;;  %v476_v38 = vsel %vm474_vm15, %v473_v34, %v471_v36  ;;  %vm841_vm15 = vcmp.lt.s32.totalorder %v1623_v35, 113 }
  0xc9   : > { %v468_v39 = vmul.f32 %v1365_v29, %v466_v32  ;;  %v481_v40 = vcombine.low %v476_v38, %v475_v37  ;;  %1125 = vrot.lane.b32.xlu1 %v1565_v33, %s1521_s7  ;;  %1123 = vrot.lane.b32.xlu0 %v1561_v31, %s1521_s7  ;;  %v1368_v38 = vld [vmem:[%s2089_s1 + $0x3c] sm:$0xf] }
  0xcb   : > { %v469_v42 = vadd.f32 %v468_v39, %v447_v30  ;;  %v488_v43 = vrot.slane %v481_v40, %v1643_v2  ;;  %v495_v44 = vpop.permute.xlu1 %494  ;;  %v493_v45 = vpop.permute.xlu0 %492 }
  0xcc   : > { %v497_v46 = vsel %vm496_vm0, %v493_v45, %v495_v44  ;;  %v498_v47 = vsel %vm496_vm0, %v495_v44, %v493_v45  ;;  %v1369_v45 = vld [vmem:[%s2089_s1 + $0x40] sm:$0xf]  ;;  %vm863_vm0 = vcmp.lt.s32.totalorder %v1623_v35, 112 }
  0xcd   : > { %v490_v48 = vmul.f32 %v1366_v41, %v488_v43  ;;  %v503_v49 = vcombine.low %v498_v47, %v497_v46  ;;  %1147 = vrot.lane.b32.xlu1 %v1565_v33, %s1522_s13  ;;  %1145 = vrot.lane.b32.xlu0 %v1561_v31, %s1522_s13 }
  0xcf   : > { %v491_v51 = vadd.f32 %v490_v48, %v469_v42  ;;  %v510_v52 = vrot.slane %v503_v49, %v1643_v2  ;;  %v517_v53 = vpop.permute.xlu1 %516  ;;  %v515_v54 = vpop.permute.xlu0 %514 }
  0xd0   : > { %v519_v19 = vsel %vm518_vm1, %v515_v54, %v517_v53  ;;  %v520_v20 = vsel %vm518_vm1, %v517_v53, %v515_v54  ;;  %vm885_vm1 = vcmp.lt.s32.totalorder %v1623_v35, 111 }
  0xd1   : > { %v512_v55 = vmul.f32 %v1367_v50, %v510_v52  ;;  %1169 = vrot.lane.b32.xlu1 %v1565_v33, %s1523_s17  ;;  %1167 = vrot.lane.b32.xlu0 %v1561_v31, %s1523_s17  ;;  %v525_v25 = vcombine.low %v520_v20, %v519_v19 }
  0xd3   : > { %v1737_v56 = vadd.f32 %v512_v55, %v491_v51  ;;  %v539_v57 = vpop.permute.xlu1 %538  ;;  %v537_v58 = vpop.permute.xlu0 %536  ;;  %v532_v36 = vrot.slane %v525_v25, %v1643_v2  ;;  %v1370_v51 = vld [vmem:[%s2089_s1 + $0x44] sm:$0xf]  ;;  %v1373_v25 = vld [vmem:[%s2089_s1 + $0x50] sm:$0xf] }
  0xd4   : > { %v541_v23 = vsel %vm540_vm2, %v537_v58, %v539_v57  ;;  %v542_v24 = vsel %vm540_vm2, %v539_v57, %v537_v58  ;;  %vm907_vm2 = vcmp.lt.s32.totalorder %v1623_v35, 110 }
  0xd5   : > { %1191 = vrot.lane.b32.xlu1 %v1565_v33, %s1524_s18  ;;  %1189 = vrot.lane.b32.xlu0 %v1561_v31, %s1524_s18  ;;  %v547_v28 = vcombine.low %v542_v24, %v541_v23  ;;  %v534_v48 = vmul.f32 %v1368_v38, %v532_v36 }
  0xd7   : > { %v561_v59 = vpop.permute.xlu1 %560  ;;  %v559_v61 = vpop.permute.xlu0 %558  ;;  %v554_v41 = vrot.slane %v547_v28, %v1643_v2 }
  0xd8   : > { %v563_v26 = vsel %vm562_vm3, %v559_v61, %v561_v59  ;;  %v564_v27 = vsel %vm562_vm3, %v561_v59, %v559_v61  ;;  %v1371_v61 = vld [vmem:[%s2089_s1 + $0x48] sm:$0xf]  ;;  %vm929_vm3 = vcmp.lt.s32.totalorder %v1623_v35, 109 }
  0xd9   : > { %1213 = vrot.lane.b32.xlu1 %v1565_v33, %s1525_s19  ;;  %1211 = vrot.lane.b32.xlu0 %v1561_v31, %s1525_s19  ;;  %v569_v37 = vcombine.low %v564_v27, %v563_v26  ;;  %v556_v54 = vmul.f32 %v1369_v45, %v554_v41  ;;  %s143_s19 = scalar_lea.vmem %s2090_s2, %s1405_s11 }
  0xdb   : > { %v583_v62 = vpop.permute.xlu1 %582  ;;  %v581_v63 = vpop.permute.xlu0 %580  ;;  %v576_v49 = vrot.slane %v569_v37, %v1643_v2 }
  0xdc   : > { %v585_v32 = vsel %vm584_vm4, %v581_v63, %v583_v62  ;;  %v586_v34 = vsel %vm584_vm4, %v583_v62, %v581_v63  ;;  %vm951_vm4 = vcmp.lt.s32.totalorder %v1623_v35, 99 }
  0xdd   : > { %1235 = vrot.lane.b32.xlu1 %v1565_v33, %s1526_s20  ;;  %1233 = vrot.lane.b32.xlu0 %v1561_v31, %s1526_s20  ;;  %v591_v42 = vcombine.low %v586_v34, %v585_v32 }
  0xdf   : > { %v605_v0 = vpop.permute.xlu1 %604  ;;  %v603_v1 = vpop.permute.xlu0 %602  ;;  %v598_v55 = vrot.slane %v591_v42, %v1643_v2 }
  0xe0   : > { %v607_v39 = vsel %vm606_vm5, %v603_v1, %v605_v0  ;;  %v608_v40 = vsel %vm606_vm5, %v605_v0, %v603_v1  ;;  %v535_v0 = vadd.f32 %v534_v48, %v1737_v56  ;;  %v578_v1 = vmul.f32 %v1370_v51, %v576_v49 }
  0xe1   : > { %v613_v50 = vcombine.low %v608_v40, %v607_v39  ;;  %v600_v23 = vmul.f32 %v1371_v61, %v598_v55  ;;  %v1375_v39 = vld [vmem:[%s2089_s1 + $0x58] sm:$0xf]  ;;  %v716_v40 = vcombine.low %v1561_v31, %v1565_v33  ;;  %vm973_vm5 = vcmp.lt.s32.totalorder %v1623_v35, 98 }
  0xe2   : > { %v557_v20 = vadd.f32 %v556_v54, %v535_v0 }
  0xe3   : > { %v627_v3 = vpop.permute.xlu1 %626  ;;  %v625_v4 = vpop.permute.xlu0 %624  ;;  %v723_v51 = vrot.slane %v716_v40, %v1643_v2 }
  0xe4   : > { %v629_v46 = vsel %vm628_vm6, %v625_v4, %v627_v3  ;;  %v630_v47 = vsel %vm628_vm6, %v627_v3, %v625_v4  ;;  %v620_v3 = vrot.slane %v613_v50, %v1643_v2  ;;  %v579_v26 = vadd.f32 %v578_v1, %v557_v20 }
  0xe5   : > { %v635_v57 = vcombine.low %v630_v47, %v629_v46  ;;  %v1376_v46 = vld [vmem:[%s2089_s1 + $0x5c] sm:$0xf]  ;;  %vm995_vm6 = vcmp.lt.s32.totalorder %v1623_v35, 97 }
  0xe7   : > { %v649_v5 = vpop.permute.xlu1 %648  ;;  %v647_v6 = vpop.permute.xlu0 %646 }
  0xe8   : > { %v651_v52 = vsel %vm650_vm7, %v647_v6, %v649_v5  ;;  %v652_v53 = vsel %vm650_vm7, %v649_v5, %v647_v6  ;;  %v1372_v5 = vld [vmem:[%s2089_s1 + $0x4c] sm:$0xf]  ;;  %vm1017_vm7 = vcmp.lt.s32.totalorder %v1623_v35, 96 }
  0xe9   : > { %v657_v4 = vcombine.low %v652_v53, %v651_v52  ;;  %v622_v27 = vmul.f32 %v1372_v5, %v620_v3 }
  0xeb   : > { %v671_v7 = vpop.permute.xlu1 %670  ;;  %v669_v8 = vpop.permute.xlu0 %668  ;;  %v664_v28 = vrot.slane %v657_v4, %v1643_v2 }
  0xec   : > { %v673_v62 = vsel %vm672_vm8, %v669_v8, %v671_v7  ;;  %v674_v63 = vsel %vm672_vm8, %v671_v7, %v669_v8  ;;  %v642_v7 = vrot.slane %v635_v57, %v1643_v2  ;;  %vm1039_vm8 = vcmp.lt.s32.totalorder %v1623_v35, 95 }
  0xed   : > { %v679_v8 = vcombine.low %v674_v63, %v673_v62 }
  0xee   : > { %v644_v34 = vmul.f32 %v1373_v25, %v642_v7  ;;  %v1379_v7 = vld [vmem:[%s2089_s1 + $0x68] sm:$0xf] }
  0xef   : > { %v1745_v9 = vpop.permute.xlu1 %692  ;;  %v1747_v10 = vpop.permute.xlu0 %690  ;;  %v686_v36 = vrot.slane %v679_v8, %v1643_v2 }
  0xf0   : > { %v695_v6 = vsel %vm694_vm9, %v1747_v10, %v1745_v9  ;;  %v696_v19 = vsel %vm694_vm9, %v1745_v9, %v1747_v10  ;;  %v1374_v9 = vld [vmem:[%s2089_s1 + $0x54] sm:$0xf]  ;;  %v601_v10 = vadd.f32 %v600_v23, %v579_v26  ;;  %vm1061_vm9 = vcmp.lt.s32.totalorder %v1623_v35, 94 }
  0xf1   : > { %v701_v32 = vcombine.low %v696_v19, %v695_v6  ;;  %v666_v42 = vmul.f32 %v1374_v9, %v664_v28  ;;  %v688_v50 = vmul.f32 %v1375_v39, %v686_v36  ;;  %v1380_v28 = vld [vmem:[%s2089_s1 + $0x6c] sm:$0xf]  ;;  %v1381_v39 = vld [vmem:[%s2089_s1 + $0x70] sm:$0xf] }
  0xf2   : > { %v623_v41 = vadd.f32 %v622_v27, %v601_v10 }
  0xf3   : > { %v1749_v11 = vpop.permute.xlu1 %729  ;;  %v1751_v12 = vpop.permute.xlu0 %727  ;;  %v708_v45 = vrot.slane %v701_v32, %v1643_v2 }
  0xf4   : > { %v732_v47 = vsel %vm731_vm10, %v1751_v12, %v1749_v11  ;;  %v733_v48 = vsel %vm731_vm10, %v1749_v11, %v1751_v12  ;;  %v645_v49 = vadd.f32 %v644_v34, %v623_v41  ;;  %v1377_v11 = vld [vmem:[%s2089_s1 + $0x60] sm:$0xf]  ;;  %vm1083_vm10 = vcmp.lt.s32.totalorder %v1623_v35, 93 }
  0xf5   : > { %v710_v55 = vmul.f32 %v1376_v46, %v708_v45  ;;  %v738_v12 = vcombine.low %v732_v47, %v733_v48  ;;  %v725_v0 = vmul.f32 %v1377_v11, %v723_v51  ;;  %v1382_v46 = vld [vmem:[%s2089_s1 + $0x74] sm:$0xf] }
  0xf6   : > { %v667_v54 = vadd.f32 %v666_v42, %v645_v49 }
  0xf7   : > { %v1753_v13 = vpop.permute.xlu1 %751  ;;  %v1755_v14 = vpop.permute.xlu0 %749  ;;  %v745_v5 = vrot.slane %v738_v12, %v1643_v2 }
  0xf8   : > { %v754_v52 = vsel %vm753_vm11, %v1755_v14, %v1753_v13  ;;  %v755_v53 = vsel %vm753_vm11, %v1753_v13, %v1755_v14  ;;  %v689_v62 = vadd.f32 %v688_v50, %v667_v54  ;;  %vm1105_vm11 = vcmp.lt.s32.totalorder %v1623_v35, 83 }
  0xf9   : > { %v760_v63 = vcombine.low %v754_v52, %v755_v53  ;;  %v1383_v53 = vld [vmem:[%s2089_s1 + $0x78] sm:$0xf] }
  0xfa   : > { %v711_v4 = vadd.f32 %v710_v55, %v689_v62 }
  0xfb   : > { %v1757_v15 = vpop.permute.xlu1 %773  ;;  %v1759_v16 = vpop.permute.xlu0 %771  ;;  %v767_v20 = vrot.slane %v760_v63, %v1643_v2 }
  0xfc   : > { %v776_v57 = vsel %vm775_vm12, %v1759_v16, %v1757_v15  ;;  %v777_v61 = vsel %vm775_vm12, %v1757_v15, %v1759_v16  ;;  %v1378_v15 = vld [vmem:[%s2089_s1 + $0x64] sm:$0xf]  ;;  %vm1127_vm12 = vcmp.lt.s32.totalorder %v1623_v35, 82 }
  0xfd   : > { %v782_v6 = vcombine.low %v776_v57, %v777_v61  ;;  %v769_v10 = vmul.f32 %v1379_v7, %v767_v20  ;;  %v1384_v57 = vld [vmem:[%s2089_s1 + $0x7c] sm:$0xf] }
  0xff   : > { %v1762_v17 = vpop.permute.xlu1 %795  ;;  %v1764_v18 = vpop.permute.xlu0 %793  ;;  %v789_v26 = vrot.slane %v782_v6, %v1643_v2 }
 0x100   : > { %v798_v1 = vsel %vm797_vm13, %v1764_v18, %v1762_v17  ;;  %v799_v3 = vsel %vm797_vm13, %v1762_v17, %v1764_v18  ;;  %vm1149_vm13 = vcmp.lt.s32.totalorder %v1623_v35, 81 }
 0x101   : > { %v804_v23 = vcombine.low %v798_v1, %v799_v3  ;;  %v791_v41 = vmul.f32 %v1380_v28, %v789_v26 }
 0x103   : > { %v1768_v21 = vpop.permute.xlu1 %817  ;;  %v1770_v22 = vpop.permute.xlu0 %815 }
 0x104   : > { %v820_v16 = vsel %vm819_vm14, %v1770_v22, %v1768_v21  ;;  %v821_v19 = vsel %vm819_vm14, %v1768_v21, %v1770_v22  ;;  %v726_v21 = vadd.f32 %v725_v0, %v711_v4  ;;  %v747_v22 = vmul.f32 %v1378_v15, %v745_v5  ;;  %v1385_v4 = vld [vmem:[%s2089_s1 + $0x80] sm:$0xf] }
 0x105   : > { %v826_v27 = vcombine.low %v820_v16, %v821_v19  ;;  %v1386_v19 = vld [vmem:[%s2089_s1 + $0x84] sm:$0xf]  ;;  %vm1171_vm14 = vcmp.lt.s32.totalorder %v1623_v35, 80 }
 0x107   : > { %v1774_v29 = vpop.permute.xlu1 %839  ;;  %v1776_v30 = vpop.permute.xlu0 %837  ;;  %v833_v42 = vrot.slane %v826_v27, %v1643_v2 }
 0x108   : > { %v842_v8 = vsel %vm841_vm15, %v1776_v30, %v1774_v29  ;;  %v843_v25 = vsel %vm841_vm15, %v1774_v29, %v1776_v30  ;;  %v811_v29 = vrot.slane %v804_v23, %v1643_v2  ;;  %vm1193_vm15 = vcmp.lt.s32.totalorder %v1623_v35, 79 }
 0x109   : > { %v848_v30 = vcombine.low %v842_v8, %v843_v25  ;;  %v835_v55 = vmul.f32 %v1382_v46, %v833_v42 }
 0x10b   : > { %v1785_v43 = vpop.permute.xlu1 %861  ;;  %v1787_v44 = vpop.permute.xlu0 %859  ;;  %v855_v49 = vrot.slane %v848_v30, %v1643_v2 }
 0x10c   : > { %v864_v32 = vsel %vm863_vm0, %v1787_v44, %v1785_v43  ;;  %v865_v9 = vsel %vm863_vm0, %v1785_v43, %v1787_v44  ;;  %v748_v44 = vadd.f32 %v747_v22, %v726_v21  ;;  %v1387_v22 = vld [vmem:[%s2089_s1 + $0x88] sm:$0xf]  ;;  %vm1215_vm0 = vcmp.lt.s32.totalorder %v1623_v35, 78 }
 0x10d   : > { %v870_v45 = vcombine.low %v864_v32, %v865_v9  ;;  %v857_v62 = vmul.f32 %v1383_v53, %v855_v49  ;;  %v1388_v9 = vld [vmem:[%s2089_s1 + $0x8c] sm:$0xf] }
 0x10f   : > { %v1799_v58 = vpop.permute.xlu1 %883  ;;  %v1801_v59 = vpop.permute.xlu0 %881  ;;  %v877_v11 = vrot.slane %v870_v45, %v1643_v2 }
 0x110   : > { %v886_v40 = vsel %vm885_vm1, %v1801_v59, %v1799_v58  ;;  %v887_v43 = vsel %vm885_vm1, %v1799_v58, %v1801_v59  ;;  %v770_v58 = vadd.f32 %v769_v10, %v748_v44  ;;  %v813_v59 = vmul.f32 %v1381_v39, %v811_v29  ;;  %v1389_v44 = vld [vmem:[%s2089_s1 + $0x90] sm:$0xf] }
 0x111   : > { %v892_v50 = vcombine.low %v886_v40, %v887_v43  ;;  %v879_v6 = vmul.f32 %v1384_v57, %v877_v11  ;;  %vm1237_vm1 = vcmp.lt.s32.totalorder %v1623_v35, 77 }
 0x113   : > { %v1816_v56 = vpop.permute.xlu1 %905  ;;  %v1818_v24 = vpop.permute.xlu0 %903  ;;  %v899_v63 = vrot.slane %v892_v50, %v1643_v2 }
 0x114   : > { %v908_v47 = vsel %vm907_vm2, %v1818_v24, %v1816_v56  ;;  %v909_v48 = vsel %vm907_vm2, %v1816_v56, %v1818_v24  ;;  %v792_v24 = vadd.f32 %v791_v41, %v770_v58  ;;  %v1390_v58 = vld [vmem:[%s2089_s1 + $0x94] sm:$0xf] }
 0x115   : > { %v914_v12 = vcombine.low %v908_v47, %v909_v48  ;;  %v901_v23 = vmul.f32 %v1385_v4, %v899_v63 }
 0x117   : > { %v1829_v37 = vpop.permute.xlu1 %927  ;;  %v1831_v38 = vpop.permute.xlu0 %925  ;;  %v921_v15 = vrot.slane %v914_v12, %v1643_v2 }
 0x118   : > { %v930_v54 = vsel %vm929_vm3, %v1831_v38, %v1829_v37  ;;  %v931_v56 = vsel %vm929_vm3, %v1829_v37, %v1831_v38  ;;  %v814_v38 = vadd.f32 %v813_v59, %v792_v24  ;;  %v1391_v24 = vld [vmem:[%s2089_s1 + $0x98] sm:$0xf] }
 0x119   : > { %v936_v0 = vcombine.low %v930_v54, %v931_v56 }
 0x11b   : > { %v1848_v31 = vpop.permute.xlu1 %949  ;;  %v1850_v33 = vpop.permute.xlu0 %947  ;;  %v943_v7 = vrot.slane %v936_v0, %v1643_v2 }
 0x11c   : > { %v952_v61 = vsel %vm951_vm4, %v1850_v33, %v1848_v31  ;;  %v953_v37 = vsel %vm951_vm4, %v1848_v31, %v1850_v33  ;;  %v836_v33 = vadd.f32 %v835_v55, %v814_v38  ;;  %v1392_v38 = vld [vmem:[%s2089_s1 + $0x9c] sm:$0xf] }
 0x11d   : > { %v958_v16 = vcombine.low %v952_v61, %v953_v37 }
 0x11f   : > { %v1866_v13 = vpop.permute.xlu1 %971  ;;  %v1868_v14 = vpop.permute.xlu0 %969  ;;  %v965_v28 = vrot.slane %v958_v16, %v1643_v2 }
 0x120   : > { %v974_v5 = vsel %vm973_vm5, %v1868_v14, %v1866_v13  ;;  %v975_v31 = vsel %vm973_vm5, %v1866_v13, %v1868_v14  ;;  %v858_v14 = vadd.f32 %v857_v62, %v836_v33  ;;  %v1393_v33 = vld [vmem:[%s2089_s1 + $0xa0] sm:$0xf] }
 0x121   : > { %v980_v8 = vcombine.low %v974_v5, %v975_v31  ;;  %v967_v46 = vmul.f32 %v1388_v9, %v965_v28 }
 0x123   : > { %v1885_v17 = vpop.permute.xlu1 %993  ;;  %v1887_v18 = vpop.permute.xlu0 %991 }
 0x124   : > { %v996_v20 = vsel %vm995_vm6, %v1887_v18, %v1885_v17  ;;  %v997_v13 = vsel %vm995_vm6, %v1885_v17, %v1887_v18  ;;  %v880_v17 = vadd.f32 %v879_v6, %v858_v14  ;;  %v923_v18 = vmul.f32 %v1386_v19, %v921_v15  ;;  %v1394_v14 = vld [vmem:[%s2089_s1 + $0xa4] sm:$0xf] }
 0x125   : > { %v1002_v32 = vcombine.low %v996_v20, %v997_v13 }
 0x126   : > { %v902_v30 = vadd.f32 %v901_v23, %v880_v17 }
 0x127   : > { %v1016_v34 = vpop.permute.xlu1 %1015  ;;  %v1014_v36 = vpop.permute.xlu0 %1013  ;;  %v1009_v47 = vrot.slane %v1002_v32, %v1643_v2 }
 0x128   : > { %v1018_v26 = vsel %vm1017_vm7, %v1014_v36, %v1016_v34  ;;  %v1019_v27 = vsel %vm1017_vm7, %v1016_v34, %v1014_v36  ;;  %v945_v34 = vmul.f32 %v1387_v22, %v943_v7  ;;  %v987_v36 = vrot.slane %v980_v8, %v1643_v2 }
 0x129   : > { %v1024_v39 = vcombine.low %v1018_v26, %v1019_v27  ;;  %v924_v45 = vadd.f32 %v923_v18, %v902_v30  ;;  %v1011_v57 = vmul.f32 %v1390_v58, %v1009_v47  ;;  %v1395_v26 = vld [vmem:[%s2089_s1 + $0xa8] sm:$0xf]  ;;  %v1398_v47 = vld [vmem:[%s2089_s1 + $0xb4] sm:$0xf] }
 0x12b   : > { %v1038_v51 = vpop.permute.xlu1 %1037  ;;  %v1036_v52 = vpop.permute.xlu0 %1035  ;;  %v946_v50 = vadd.f32 %v945_v34, %v924_v45 }
 0x12c   : > { %v1040_v10 = vsel %vm1039_vm8, %v1036_v52, %v1038_v51  ;;  %v1041_v29 = vsel %vm1039_vm8, %v1038_v51, %v1036_v52  ;;  %v989_v51 = vmul.f32 %v1389_v44, %v987_v36  ;;  %v1031_v52 = vrot.slane %v1024_v39, %v1643_v2 }
 0x12d   : > { %v1046_v48 = vcombine.low %v1040_v10, %v1041_v29  ;;  %v968_v12 = vadd.f32 %v967_v46, %v946_v50  ;;  %v1396_v10 = vld [vmem:[%s2089_s1 + $0xac] sm:$0xf] }
 0x12f   : > { %v1060_v1 = vpop.permute.xlu1 %1059  ;;  %v1058_v3 = vpop.permute.xlu0 %1057  ;;  %v1053_v61 = vrot.slane %v1046_v48, %v1643_v2  ;;  %v990_v0 = vadd.f32 %v989_v51, %v968_v12  ;;  %v1399_v51 = vld [vmem:[%s2089_s1 + $0xb8] sm:$0xf] }
 0x130   : > { %v1062_v41 = vsel %vm1061_vm9, %v1058_v3, %v1060_v1  ;;  %v1063_v42 = vsel %vm1061_vm9, %v1060_v1, %v1058_v3  ;;  %v1033_v1 = vmul.f32 %v1391_v24, %v1031_v52 }
 0x131   : > { %v1068_v53 = vcombine.low %v1062_v41, %v1063_v42  ;;  %v1012_v16 = vadd.f32 %v1011_v57, %v990_v0  ;;  %v1055_v19 = vmul.f32 %v1392_v38, %v1053_v61 }
 0x133   : > { %v1082_v25 = vpop.permute.xlu1 %1081  ;;  %v1080_v21 = vpop.permute.xlu0 %1079  ;;  %v1075_v3 = vrot.slane %v1068_v53, %v1643_v2  ;;  %v1034_v23 = vadd.f32 %v1033_v1, %v1012_v16 }
 0x134   : > { %v1084_v59 = vsel %vm1083_vm10, %v1080_v21, %v1082_v25  ;;  %v1085_v49 = vsel %vm1083_vm10, %v1082_v25, %v1080_v21 }
 0x135   : > { %v1090_v37 = vcombine.low %v1084_v59, %v1085_v49  ;;  %v1077_v7 = vmul.f32 %v1393_v33, %v1075_v3  ;;  %v1056_v18 = vadd.f32 %v1055_v19, %v1034_v23  ;;  %v1401_v3 = vld [vmem:[%s2089_s1 + $0xc0] sm:$0xf]  ;;  %v1272_v23 = vsub.s32 2, %v1637_v60 }
 0x137   : > { %v1104_v40 = vpop.permute.xlu1 %1103  ;;  %v1102_v43 = vpop.permute.xlu0 %1101  ;;  %v1097_v20 = vrot.slane %v1090_v37, %v1643_v2  ;;  %v1078_v29 = vadd.f32 %v1077_v7, %v1056_v18 }
 0x138   : > { %v1106_v55 = vsel %vm1105_vm11, %v1102_v43, %v1104_v40  ;;  %v1107_v11 = vsel %vm1105_vm11, %v1104_v40, %v1102_v43  ;;  %v1397_v40 = vld [vmem:[%s2089_s1 + $0xb0] sm:$0xf] }
 0x139   : > { %v1112_v4 = vcombine.low %v1106_v55, %v1107_v11  ;;  %v1099_v28 = vmul.f32 %v1394_v14, %v1097_v20  ;;  %v1400_v55 = vld [vmem:[%s2089_s1 + $0xbc] sm:$0xf]  ;;  %v1268_v14 = vsub.s32 0, %v1637_v60 }
 0x13b   : > { %v1126_v54 = vpop.permute.xlu1 %1125  ;;  %v1124_v56 = vpop.permute.xlu0 %1123  ;;  %v1119_v8 = vrot.slane %v1112_v4, %v1643_v2  ;;  %v1100_v41 = vadd.f32 %v1099_v28, %v1078_v29 }
 0x13c   : > { %v1128_v62 = vsel %vm1127_vm12, %v1124_v56, %v1126_v54  ;;  %v1129_v63 = vsel %vm1127_vm12, %v1126_v54, %v1124_v56 }
 0x13d   : > { %v1134_v13 = vcombine.low %v1128_v62, %v1129_v63  ;;  %v1121_v30 = vmul.f32 %v1395_v26, %v1119_v8  ;;  %v1469_v26 = vld [vmem:[%s1558_s14] sm:$0xff] }
 0x13f   : > { %v1148_v5 = vpop.permute.xlu1 %1147  ;;  %v1146_v31 = vpop.permute.xlu0 %1145  ;;  %v1141_v32 = vrot.slane %v1134_v13, %v1643_v2  ;;  %v1122_v48 = vadd.f32 %v1121_v30, %v1100_v41 }
 0x140   : > { %v1150_v6 = vsel %vm1149_vm13, %v1146_v31, %v1148_v5  ;;  %v1151_v15 = vsel %vm1149_vm13, %v1148_v5, %v1146_v31 }
 0x141   : > { %v1156_v25 = vcombine.low %v1150_v6, %v1151_v15  ;;  %v1143_v42 = vmul.f32 %v1396_v10, %v1141_v32 }
 0x143   : > { %v1170_v21 = vpop.permute.xlu1 %1169  ;;  %v1168_v22 = vpop.permute.xlu0 %1167  ;;  %v1163_v34 = vrot.slane %v1156_v25, %v1643_v2  ;;  %v1144_v54 = vadd.f32 %v1143_v42, %v1122_v48 }
 0x144   : > { %v1172_v27 = vsel %vm1171_vm14, %v1168_v22, %v1170_v21  ;;  %v1173_v17 = vsel %vm1171_vm14, %v1170_v21, %v1168_v22 }
 0x145   : > { %v1178_v9 = vcombine.low %v1172_v27, %v1173_v17  ;;  %v1165_v58 = vmul.f32 %v1397_v40, %v1163_v34 }
 0x147   : > { %v1192_v36 = vpop.permute.xlu1 %1191  ;;  %v1190_v39 = vpop.permute.xlu0 %1189  ;;  %v1185_v45 = vrot.slane %v1178_v9, %v1643_v2  ;;  %v1166_v11 = vadd.f32 %v1165_v58, %v1144_v54 }
 0x148   : > { %v1194_v43 = vsel %vm1193_vm15, %v1190_v39, %v1192_v36  ;;  %v1195_v44 = vsel %vm1193_vm15, %v1192_v36, %v1190_v39 }
 0x149   : > { %v1200_v46 = vcombine.low %v1194_v43, %v1195_v44  ;;  %v1187_v56 = vmul.f32 %v1398_v47, %v1185_v45 }
 0x14b   : > { %v1207_v59 = vrot.slane %v1200_v46, %v1643_v2  ;;  %v1214_v49 = vpop.permute.xlu1 %1213  ;;  %v1212_v50 = vpop.permute.xlu0 %1211  ;;  %v1188_v63 = vadd.f32 %v1187_v56, %v1166_v11 }
 0x14c   : > { %v1216_v52 = vsel %vm1215_vm0, %v1212_v50, %v1214_v49  ;;  %v1217_v53 = vsel %vm1215_vm0, %v1214_v49, %v1212_v50 }
 0x14d   : > { %v1222_v24 = vcombine.low %v1216_v52, %v1217_v53  ;;  %v1209_v12 = vmul.f32 %v1399_v51, %v1207_v59 }
 0x14f   : > { %v1229_v57 = vrot.slane %v1222_v24, %v1643_v2  ;;  %v1236_v61 = vpop.permute.xlu1 %1235  ;;  %v1234_v37 = vpop.permute.xlu0 %1233  ;;  %v1210_v35 = vadd.f32 %v1209_v12, %v1188_v63 }
 0x150   : > { %v1238_v38 = vsel %vm1237_vm1, %v1234_v37, %v1236_v61  ;;  %v1239_v62 = vsel %vm1237_vm1, %v1236_v61, %v1234_v37 }
 0x151   : > { %v1231_v0 = vmul.f32 %v1400_v55, %v1229_v57  ;;  %v1244_v1 = vcombine.low %v1238_v38, %v1239_v62 }
 0x153   : > { %v1251_v4 = vrot.slane %v1244_v1, %v1643_v2  ;;  %v1232_v5 = vadd.f32 %v1231_v0, %v1210_v35 }
 0x155   : > { %v1253_v31 = vmul.f32 %v1401_v3, %v1251_v4 }
 0x157   : > { %v1254_v33 = vadd.f32 %v1253_v31, %v1232_v5 }
 0x159   : > { %v1402_v6 = vrot.slane %v1254_v33, 9 }
 0x15b   : > { %v1259_v15 = vadd.f32 %v1402_v6, %v1254_v33 }
 0x15d   : > { %v1260_v16 = vsub.f32 0.0, %v1259_v15 }
 0x15f   : > { %v1261_v19 = vmul.f32 1.442695, %v1260_v16 }
 0x161   : > { %1465 = vpow2.f32 %v1261_v19 }
 0x16b   : > { %v1466_v20 = vpop.eup %1465 }
 0x16c   : > { %v1263_v13 = vadd.f32 1.0, %v1466_v20 }
 0x16e   : > { %1467 = vrcp.f32 %v1263_v13 }
 0x178   : > { %v1468_v7 = vpop.eup %1467 }
 0x179   : > { %v1269_v8 = vrot.slane %v1468_v7, %v1268_v14  ;;  %v1273_v2 = vrot.slane %v1468_v7, %v1272_v23 }
 0x17b   : > { %v1279_v25 = vrot.slane %v1269_v8, %v1268_v14  ;;  %v1283_v21 = vrot.slane %v1273_v2, %v1268_v14 }
 0x17d   : > { %v1286_v22 = vcombine.low %v1279_v25, %v1283_v21 }
 0x17f   : > { %v1288_v27 = vmul.f32 %v1469_v26, %v1286_v22 }
 0x181   : > { %1289 = vst [vmem:[%s143_s19] sm:$0xff] %v1288_v27 }
 0x182 PF: > { %s12_s9 = sadd.s32 1, %s1476_s9  }
 0x183   : > { %p9_p4 = scmp.ge.s32.totalorder %s12_s9, 4  }
 0x185   :  { %11 = sbr.rel (!%p9_p4) target bundleno = 1 (0x1), region = 106 }

</bundles_post_ra>
